<compile_context>
chip_gen: v7x
topology: tpu7x:2x2x1
jax: 0.10.0
libtpu: 0.0.40
codegen_flags: <defaults>
</compile_context>

<pallas_src>
import functools

import jax
import jax.numpy as jnp
from jax.experimental import pallas as pl
from jax.experimental.pallas import tpu as pltpu


def gru_kernel(x_ref,
               wih0_ref, whh0_ref, b0gi_ref, b0hn_ref,
               w1_ref, b1rz_ref, b1in_ref, b1hn_ref,
               wfc_ref, bfc_ref,
               out_ref,
               *, hidden_dim, seq_len, batch_tile):
    H = hidden_dim
    T = seq_len
    B = batch_tile

    # Hoist all constant operands out of the time loop (loaded once per tile).
    wih0 = wih0_ref[...]          # (D, 3H)  bf16
    whh0 = whh0_ref[...]          # (H, 3H)  bf16
    b0gi = b0gi_ref[...]          # (1, 3H)  f32  (b_ih0, with b_hh0 folded in for r,z)
    b0hn = b0hn_ref[...]          # (1, H)   f32  (b_hh0 n-gate)
    w1 = w1_ref[...]              # (2H, 4H) bf16 block-stacked: [rz | i_n | h_n]
    b1rz = b1rz_ref[...]          # (1, 2H)  f32  (b_ih1 + b_hh1 for r,z)
    b1in = b1in_ref[...]          # (1, H)   f32
    b1hn = b1hn_ref[...]          # (1, H)   f32

    # Layer-0 input projection for all timesteps in one batched MXU matmul,
    # off the serial recurrence chain.
    x_bf = x_ref[...].astype(jnp.bfloat16)                         # (B, T, D)
    gi0 = jnp.dot(x_bf.reshape(B * T, x_bf.shape[-1]), wih0,
                  preferred_element_type=jnp.float32) + b0gi       # (B*T, 3H)
    gi0 = gi0.reshape(B, T, 3 * H)

    h0 = jnp.zeros((B, H), jnp.float32)
    h1 = jnp.zeros((B, H), jnp.float32)

    # Fully unrolled time loop; h0/h1 live in vregs across iterations.
    for t in range(T):
        # ---- layer 0: only the h-dependent matmul remains per step ----
        gi = gi0[:, t, :]                                          # (B, 3H) f32
        gh = jnp.dot(h0.astype(jnp.bfloat16), whh0,
                     preferred_element_type=jnp.float32)           # (B, 3H) f32
        rz = jax.nn.sigmoid(gi[:, :2 * H] + gh[:, :2 * H])         # r,z in one EUP pass
        r, z = rz[:, :H], rz[:, H:]
        n = jnp.tanh(gi[:, 2 * H:] + r * (gh[:, 2 * H:] + b0hn))
        h0 = n + z * (h0 - n)                                      # (1-z)*n + z*h

        # ---- layer 1: single fused matmul over [h0, h1] ----
        hc = jnp.concatenate([h0, h1], axis=1).astype(jnp.bfloat16)  # (B, 2H)
        g = jnp.dot(hc, w1, preferred_element_type=jnp.float32)      # (B, 4H)
        rz1 = jax.nn.sigmoid(g[:, :2 * H] + b1rz)
        r1, z1 = rz1[:, :H], rz1[:, H:]
        n1 = jnp.tanh(g[:, 2 * H:3 * H] + b1in + r1 * (g[:, 3 * H:] + b1hn))
        h1 = n1 + z1 * (h1 - n1)

    # fc on the top-layer hidden state at the last timestep (one-shot, f32).
    out_ref[...] = (jnp.dot(h1, wfc_ref[...],
                            preferred_element_type=jnp.float32) + bfc_ref[...])


def prepare_kernel_params(params, hidden_dim):
    """Build kernel-ready operands: bf16 weights, stacked layer-1 weight,
    folded biases. Gate order is PyTorch's [r, z, n]."""
    H = hidden_dim
    f32 = jnp.float32
    bf16 = jnp.bfloat16

    wih0 = params["w_ih0_t"].astype(bf16)                      # (D, 3H)
    whh0 = params["w_hh0_t"].astype(bf16)                      # (H, 3H)
    b_ih0, b_hh0 = params["b_ih0"], params["b_hh0"]            # (1, 3H)
    b0_gi = jnp.concatenate(
        [b_ih0[:, :2 * H] + b_hh0[:, :2 * H], b_ih0[:, 2 * H:]], axis=1
    ).astype(f32)                                              # (1, 3H)
    b0_hn = b_hh0[:, 2 * H:].astype(f32)                       # (1, H)

    w_ih1_t = params["w_ih1_t"]                                # (H, 3H)
    w_hh1_t = params["w_hh1_t"]                                # (H, 3H)
    zeros = jnp.zeros((H, H), f32)
    # Columns: [0:2H] = r,z (both inputs), [2H:3H] = i_n (h0 only), [3H:4H] = h_n (h1 only)
    top = jnp.concatenate([w_ih1_t[:, :2 * H], w_ih1_t[:, 2 * H:], zeros], axis=1)
    bot = jnp.concatenate([w_hh1_t[:, :2 * H], zeros, w_hh1_t[:, 2 * H:]], axis=1)
    w1 = jnp.concatenate([top, bot], axis=0).astype(bf16)      # (2H, 4H)

    b_ih1, b_hh1 = params["b_ih1"], params["b_hh1"]
    b1_rz = (b_ih1[:, :2 * H] + b_hh1[:, :2 * H]).astype(f32)  # (1, 2H)
    b1_in = b_ih1[:, 2 * H:].astype(f32)                       # (1, H)
    b1_hn = b_hh1[:, 2 * H:].astype(f32)                       # (1, H)

    w_fc = params["w_fc_t"].astype(f32)                        # (H, O)
    b_fc = params["b_fc"].astype(f32)                          # (1, O)

    return (wih0, whh0, b0_gi, b0_hn, w1, b1_rz, b1_in, b1_hn, w_fc, b_fc)


def gru_model_forward(x, params, *, hidden_dim, output_dim):
    """x: (B, T, D) float32 (PyTorch batch_first=True). Returns (B, O)."""
    B, T, D = x.shape
    H = hidden_dim
    O = output_dim
    kp = prepare_kernel_params(params, H)

    # Batch tiling: single tile at small B; multiples of 8 at larger B so the
    # "parallel" grid axis can shard across TensorCores (v7x) and x streams
    # per tile instead of assuming whole-x VMEM residency.
    if B > 8 and B % 8 == 0:
        b_tile = min(B, 64)
        while B % b_tile != 0:
            b_tile //= 2
    else:
        b_tile = B
    grid = (B // b_tile,)

    kernel = functools.partial(gru_kernel, hidden_dim=H, seq_len=T,
                               batch_tile=b_tile)

    def replicated_spec(shape):
        nd = len(shape)
        return pl.BlockSpec(shape, lambda b: (0,) * nd)

    out = pl.pallas_call(
        kernel,
        out_shape=jax.ShapeDtypeStruct((B, O), jnp.float32),
        grid=grid,
        in_specs=[pl.BlockSpec((b_tile, T, D), lambda b: (b, 0, 0))]
                 + [replicated_spec(a.shape) for a in kp],
        out_specs=pl.BlockSpec((b_tile, O), lambda b: (b, 0)),
        compiler_params=pltpu.CompilerParams(
            dimension_semantics=("parallel",)),
    )(x, *kp)
    return out


def init_params(key, input_dim, hidden_dim, output_dim):
    """Deterministic init mimicking PyTorch's U(-1/sqrt(H), 1/sqrt(H))."""
    H = hidden_dim
    bound = 1.0 / jnp.sqrt(jnp.float32(H))
    keys = jax.random.split(key, 10)

    def u(k, shape):
        return jax.random.uniform(k, shape, jnp.float32, -bound, bound)

    # Layer 0: W_ih (3H, D), W_hh (3H, H); stored transposed for x @ W.T
    w_ih0 = u(keys[0], (3 * H, input_dim))
    w_hh0 = u(keys[1], (3 * H, H))
    b_ih0 = u(keys[2], (1, 3 * H))
    b_hh0 = u(keys[3], (1, 3 * H))
    # Layer 1: input is H
    w_ih1 = u(keys[4], (3 * H, H))
    w_hh1 = u(keys[5], (3 * H, H))
    b_ih1 = u(keys[6], (1, 3 * H))
    b_hh1 = u(keys[7], (1, 3 * H))
    # fc: Linear(H, O)
    w_fc = u(keys[8], (output_dim, H))
    b_fc = u(keys[9], (1, output_dim))

    return {
        "w_ih0_t": w_ih0.T, "w_hh0_t": w_hh0.T, "b_ih0": b_ih0, "b_hh0": b_hh0,
        "w_ih1_t": w_ih1.T, "w_hh1_t": w_hh1.T, "b_ih1": b_ih1, "b_hh1": b_hh1,
        "w_fc_t": w_fc.T, "b_fc": b_fc,
    }


def _gru_cell_ref(x_t, h_prev, w_ih_t, w_hh_t, b_ih, b_hh, H):
    """Pure f32 PyTorch GRUCell semantics (reference)."""
    gi = jnp.dot(x_t, w_ih_t) + b_ih
    gh = jnp.dot(h_prev, w_hh_t) + b_hh
    i_r, i_z, i_n = gi[:, :H], gi[:, H:2 * H], gi[:, 2 * H:]
    h_r, h_z, h_n = gh[:, :H], gh[:, H:2 * H], gh[:, 2 * H:]
    r = jax.nn.sigmoid(i_r + h_r)
    z = jax.nn.sigmoid(i_z + h_z)
    n = jnp.tanh(i_n + r * h_n)
    return (1.0 - z) * n + z * h_prev


def gru_model_reference(x, params, *, hidden_dim, output_dim):
    """Pure-JAX f32 reference of the stacked GRU + fc (PyTorch semantics)."""
    B, T, D = x.shape
    H = hidden_dim
    h0 = jnp.zeros((B, H), jnp.float32)
    h1 = jnp.zeros((B, H), jnp.float32)
    for t in range(T):
        x_t = x[:, t, :]
        h0 = _gru_cell_ref(x_t, h0, params["w_ih0_t"], params["w_hh0_t"],
                           params["b_ih0"], params["b_hh0"], H)
        h1 = _gru_cell_ref(h0, h1, params["w_ih1_t"], params["w_hh1_t"],
                           params["b_ih1"], params["b_hh1"], H)
    return jnp.dot(h1, params["w_fc_t"]) + params["b_fc"]


if __name__ == "__main__":
    # Small shapes consistent with the module's forward.
    B, T, D, H, O = 2, 8, 16, 32, 8

    key = jax.random.PRNGKey(0)
    k_x, k_p = jax.random.split(key)
    x = jax.random.normal(k_x, (B, T, D), jnp.float32)
    params = init_params(k_p, D, H, O)

    out = gru_model_forward(x, params, hidden_dim=H, output_dim=O)
    out = jax.block_until_ready(out)

    ref = gru_model_reference(x, params, hidden_dim=H, output_dim=O)
    assert out.shape == (B, O), out.shape
    # bf16 MXU operands (f32 accumulation) -> relaxed tolerance vs f32 reference.
    assert jnp.allclose(out, ref, atol=5e-2, rtol=5e-2), (
        out, ref, jnp.max(jnp.abs(out - ref)))

    print("KERNEL_OK")
</pallas_src>

<mosaic_0001>
module attributes {stable_mosaic.version = 11 : i64} {
  func.func @gru_kernel(%arg0: i32, %arg1: memref<2x8x16xf32, #tpu.memory_space<vmem>>, %arg2: memref<16x96xbf16, #tpu.memory_space<vmem>>, %arg3: memref<32x96xbf16, #tpu.memory_space<vmem>>, %arg4: memref<1x96xf32, #tpu.memory_space<vmem>>, %arg5: memref<1x32xf32, #tpu.memory_space<vmem>>, %arg6: memref<64x128xbf16, #tpu.memory_space<vmem>>, %arg7: memref<1x64xf32, #tpu.memory_space<vmem>>, %arg8: memref<1x32xf32, #tpu.memory_space<vmem>>, %arg9: memref<1x32xf32, #tpu.memory_space<vmem>>, %arg10: memref<32x8xf32, #tpu.memory_space<vmem>>, %arg11: memref<1x8xf32, #tpu.memory_space<vmem>>, %arg12: memref<2x8xf32, #tpu.memory_space<vmem>>) attributes {dimension_semantics = [#tpu.dimension_semantics<parallel>], iteration_bounds = array<i64: 1>, scalar_prefetch = 0 : i64, scratch_operands = 0 : i64, tpu.core_type = #tpu.core_type<tc>, window_params = [{transform_indices = @transform_0, window_bounds = array<i64: 2, 8, 16>}, {pipeline_mode = #tpu.pipeline_mode<synchronous>, transform_indices = @transform_1, window_bounds = array<i64: 16, 96>}, {pipeline_mode = #tpu.pipeline_mode<synchronous>, transform_indices = @transform_2, window_bounds = array<i64: 32, 96>}, {pipeline_mode = #tpu.pipeline_mode<synchronous>, transform_indices = @transform_3, window_bounds = array<i64: 1, 96>}, {pipeline_mode = #tpu.pipeline_mode<synchronous>, transform_indices = @transform_4, window_bounds = array<i64: 1, 32>}, {pipeline_mode = #tpu.pipeline_mode<synchronous>, transform_indices = @transform_5, window_bounds = array<i64: 64, 128>}, {pipeline_mode = #tpu.pipeline_mode<synchronous>, transform_indices = @transform_6, window_bounds = array<i64: 1, 64>}, {pipeline_mode = #tpu.pipeline_mode<synchronous>, transform_indices = @transform_7, window_bounds = array<i64: 1, 32>}, {pipeline_mode = #tpu.pipeline_mode<synchronous>, transform_indices = @transform_8, window_bounds = array<i64: 1, 32>}, {pipeline_mode = #tpu.pipeline_mode<synchronous>, transform_indices = @transform_9, window_bounds = array<i64: 32, 8>}, {pipeline_mode = #tpu.pipeline_mode<synchronous>, transform_indices = @transform_10, window_bounds = array<i64: 1, 8>}, {transform_indices = @transform_11, window_bounds = array<i64: 2, 8>}]} {
    %c0 = arith.constant 0 : index
    %c0_0 = arith.constant 0 : index
    %0 = vector.load %arg2[%c0, %c0_0] : memref<16x96xbf16, #tpu.memory_space<vmem>>, vector<16x96xbf16>
    %c0_1 = arith.constant 0 : index
    %c0_2 = arith.constant 0 : index
    %1 = vector.load %arg3[%c0_1, %c0_2] : memref<32x96xbf16, #tpu.memory_space<vmem>>, vector<32x96xbf16>
    %c0_3 = arith.constant 0 : index
    %c0_4 = arith.constant 0 : index
    %2 = vector.load %arg4[%c0_3, %c0_4] : memref<1x96xf32, #tpu.memory_space<vmem>>, vector<1x96xf32>
    %c0_5 = arith.constant 0 : index
    %c0_6 = arith.constant 0 : index
    %3 = vector.load %arg5[%c0_5, %c0_6] : memref<1x32xf32, #tpu.memory_space<vmem>>, vector<1x32xf32>
    %c0_7 = arith.constant 0 : index
    %c0_8 = arith.constant 0 : index
    %4 = vector.load %arg6[%c0_7, %c0_8] : memref<64x128xbf16, #tpu.memory_space<vmem>>, vector<64x128xbf16>
    %c0_9 = arith.constant 0 : index
    %c0_10 = arith.constant 0 : index
    %5 = vector.load %arg7[%c0_9, %c0_10] : memref<1x64xf32, #tpu.memory_space<vmem>>, vector<1x64xf32>
    %c0_11 = arith.constant 0 : index
    %c0_12 = arith.constant 0 : index
    %6 = vector.load %arg8[%c0_11, %c0_12] : memref<1x32xf32, #tpu.memory_space<vmem>>, vector<1x32xf32>
    %c0_13 = arith.constant 0 : index
    %c0_14 = arith.constant 0 : index
    %7 = vector.load %arg9[%c0_13, %c0_14] : memref<1x32xf32, #tpu.memory_space<vmem>>, vector<1x32xf32>
    %c0_15 = arith.constant 0 : index
    %c0_16 = arith.constant 0 : index
    %c0_17 = arith.constant 0 : index
    %8 = vector.load %arg1[%c0_15, %c0_16, %c0_17] : memref<2x8x16xf32, #tpu.memory_space<vmem>>, vector<2x8x16xf32>
    %9 = arith.truncf %8 : vector<2x8x16xf32> to vector<2x8x16xbf16>
    %10 = vector.shape_cast %9 : vector<2x8x16xbf16> to vector<16x16xbf16>
    %cst = arith.constant dense<0.000000e+00> : vector<16x96xf32>
    %11 = tpu.matmul %10, %0, %cst {dimension_numbers = #tpu.dot_dimension_numbers<[1], [0], [0], [1], [0, 0, 1, 1], [], []>} : vector<16x16xbf16>, vector<16x96xbf16>, vector<16x96xf32> -> vector<16x96xf32>
    %12 = vector.broadcast %2 : vector<1x96xf32> to vector<16x96xf32>
    %13 = arith.addf %11, %12 : vector<16x96xf32>
    %14 = vector.shape_cast %13 : vector<16x96xf32> to vector<2x8x96xf32>
    %cst_18 = arith.constant 0.000000e+00 : f32
    %15 = vector.broadcast %cst_18 : f32 to vector<2x32xf32>
    %cst_19 = arith.constant 0.000000e+00 : f32
    %16 = vector.broadcast %cst_19 : f32 to vector<2x32xf32>
    %17 = vector.extract_strided_slice %14 {offsets = [0, 0, 0], sizes = [2, 1, 96], strides = [1, 1, 1]} : vector<2x8x96xf32> to vector<2x1x96xf32>
    %18 = vector.shape_cast %17 : vector<2x1x96xf32> to vector<2x96xf32>
    %19 = arith.truncf %15 : vector<2x32xf32> to vector<2x32xbf16>
    %cst_20 = arith.constant dense<0.000000e+00> : vector<2x96xf32>
    %20 = tpu.matmul %19, %1, %cst_20 {dimension_numbers = #tpu.dot_dimension_numbers<[1], [0], [0], [1], [0, 0, 1, 1], [], []>} : vector<2x32xbf16>, vector<32x96xbf16>, vector<2x96xf32> -> vector<2x96xf32>
    %21 = vector.extract_strided_slice %18 {offsets = [0, 0], sizes = [2, 64], strides = [1, 1]} : vector<2x96xf32> to vector<2x64xf32>
    %22 = vector.extract_strided_slice %20 {offsets = [0, 0], sizes = [2, 64], strides = [1, 1]} : vector<2x96xf32> to vector<2x64xf32>
    %23 = arith.addf %21, %22 : vector<2x64xf32>
    %24 = arith.negf %23 : vector<2x64xf32>
    %25 = math.exp %24 : vector<2x64xf32>
    %cst_21 = arith.constant 1.000000e+00 : f32
    %26 = vector.broadcast %cst_21 : f32 to vector<2x64xf32>
    %27 = arith.addf %26, %25 : vector<2x64xf32>
    %28 = arith.divf %26, %27 : vector<2x64xf32>
    %29 = vector.extract_strided_slice %28 {offsets = [0, 0], sizes = [2, 32], strides = [1, 1]} : vector<2x64xf32> to vector<2x32xf32>
    %30 = vector.extract_strided_slice %28 {offsets = [0, 32], sizes = [2, 32], strides = [1, 1]} : vector<2x64xf32> to vector<2x32xf32>
    %31 = vector.extract_strided_slice %18 {offsets = [0, 64], sizes = [2, 32], strides = [1, 1]} : vector<2x96xf32> to vector<2x32xf32>
    %32 = vector.extract_strided_slice %20 {offsets = [0, 64], sizes = [2, 32], strides = [1, 1]} : vector<2x96xf32> to vector<2x32xf32>
    %33 = vector.broadcast %3 : vector<1x32xf32> to vector<2x32xf32>
    %34 = arith.addf %32, %33 : vector<2x32xf32>
    %35 = arith.mulf %29, %34 : vector<2x32xf32>
    %36 = arith.addf %31, %35 : vector<2x32xf32>
    %37 = math.tanh %36 : vector<2x32xf32>
    %38 = arith.subf %15, %37 : vector<2x32xf32>
    %39 = arith.mulf %30, %38 : vector<2x32xf32>
    %40 = arith.addf %37, %39 : vector<2x32xf32>
    %41 = tpu.concatenate %40, %16 in 1 : vector<2x32xf32>, vector<2x32xf32> -> vector<2x64xf32>
    %42 = arith.truncf %41 : vector<2x64xf32> to vector<2x64xbf16>
    %cst_22 = arith.constant dense<0.000000e+00> : vector<2x128xf32>
    %43 = tpu.matmul %42, %4, %cst_22 {dimension_numbers = #tpu.dot_dimension_numbers<[1], [0], [0], [1], [0, 0, 1, 1], [], []>} : vector<2x64xbf16>, vector<64x128xbf16>, vector<2x128xf32> -> vector<2x128xf32>
    %44 = vector.extract_strided_slice %43 {offsets = [0, 0], sizes = [2, 64], strides = [1, 1]} : vector<2x128xf32> to vector<2x64xf32>
    %45 = vector.broadcast %5 : vector<1x64xf32> to vector<2x64xf32>
    %46 = arith.addf %44, %45 : vector<2x64xf32>
    %47 = arith.negf %46 : vector<2x64xf32>
    %48 = math.exp %47 : vector<2x64xf32>
    %cst_23 = arith.constant 1.000000e+00 : f32
    %49 = vector.broadcast %cst_23 : f32 to vector<2x64xf32>
    %50 = arith.addf %49, %48 : vector<2x64xf32>
    %51 = arith.divf %49, %50 : vector<2x64xf32>
    %52 = vector.extract_strided_slice %51 {offsets = [0, 0], sizes = [2, 32], strides = [1, 1]} : vector<2x64xf32> to vector<2x32xf32>
    %53 = vector.extract_strided_slice %51 {offsets = [0, 32], sizes = [2, 32], strides = [1, 1]} : vector<2x64xf32> to vector<2x32xf32>
    %54 = vector.extract_strided_slice %43 {offsets = [0, 64], sizes = [2, 32], strides = [1, 1]} : vector<2x128xf32> to vector<2x32xf32>
    %55 = vector.broadcast %6 : vector<1x32xf32> to vector<2x32xf32>
    %56 = arith.addf %54, %55 : vector<2x32xf32>
    %57 = vector.extract_strided_slice %43 {offsets = [0, 96], sizes = [2, 32], strides = [1, 1]} : vector<2x128xf32> to vector<2x32xf32>
    %58 = vector.broadcast %7 : vector<1x32xf32> to vector<2x32xf32>
    %59 = arith.addf %57, %58 : vector<2x32xf32>
    %60 = arith.mulf %52, %59 : vector<2x32xf32>
    %61 = arith.addf %56, %60 : vector<2x32xf32>
    %62 = math.tanh %61 : vector<2x32xf32>
    %63 = arith.subf %16, %62 : vector<2x32xf32>
    %64 = arith.mulf %53, %63 : vector<2x32xf32>
    %65 = arith.addf %62, %64 : vector<2x32xf32>
    %66 = vector.extract_strided_slice %14 {offsets = [0, 1, 0], sizes = [2, 1, 96], strides = [1, 1, 1]} : vector<2x8x96xf32> to vector<2x1x96xf32>
    %67 = vector.shape_cast %66 : vector<2x1x96xf32> to vector<2x96xf32>
    %68 = arith.truncf %40 : vector<2x32xf32> to vector<2x32xbf16>
    %cst_24 = arith.constant dense<0.000000e+00> : vector<2x96xf32>
    %69 = tpu.matmul %68, %1, %cst_24 {dimension_numbers = #tpu.dot_dimension_numbers<[1], [0], [0], [1], [0, 0, 1, 1], [], []>} : vector<2x32xbf16>, vector<32x96xbf16>, vector<2x96xf32> -> vector<2x96xf32>
    %70 = vector.extract_strided_slice %67 {offsets = [0, 0], sizes = [2, 64], strides = [1, 1]} : vector<2x96xf32> to vector<2x64xf32>
    %71 = vector.extract_strided_slice %69 {offsets = [0, 0], sizes = [2, 64], strides = [1, 1]} : vector<2x96xf32> to vector<2x64xf32>
    %72 = arith.addf %70, %71 : vector<2x64xf32>
    %73 = arith.negf %72 : vector<2x64xf32>
    %74 = math.exp %73 : vector<2x64xf32>
    %cst_25 = arith.constant 1.000000e+00 : f32
    %75 = vector.broadcast %cst_25 : f32 to vector<2x64xf32>
    %76 = arith.addf %75, %74 : vector<2x64xf32>
    %77 = arith.divf %75, %76 : vector<2x64xf32>
    %78 = vector.extract_strided_slice %77 {offsets = [0, 0], sizes = [2, 32], strides = [1, 1]} : vector<2x64xf32> to vector<2x32xf32>
    %79 = vector.extract_strided_slice %77 {offsets = [0, 32], sizes = [2, 32], strides = [1, 1]} : vector<2x64xf32> to vector<2x32xf32>
    %80 = vector.extract_strided_slice %67 {offsets = [0, 64], sizes = [2, 32], strides = [1, 1]} : vector<2x96xf32> to vector<2x32xf32>
    %81 = vector.extract_strided_slice %69 {offsets = [0, 64], sizes = [2, 32], strides = [1, 1]} : vector<2x96xf32> to vector<2x32xf32>
    %82 = vector.broadcast %3 : vector<1x32xf32> to vector<2x32xf32>
    %83 = arith.addf %81, %82 : vector<2x32xf32>
    %84 = arith.mulf %78, %83 : vector<2x32xf32>
    %85 = arith.addf %80, %84 : vector<2x32xf32>
    %86 = math.tanh %85 : vector<2x32xf32>
    %87 = arith.subf %40, %86 : vector<2x32xf32>
    %88 = arith.mulf %79, %87 : vector<2x32xf32>
    %89 = arith.addf %86, %88 : vector<2x32xf32>
    %90 = tpu.concatenate %89, %65 in 1 : vector<2x32xf32>, vector<2x32xf32> -> vector<2x64xf32>
    %91 = arith.truncf %90 : vector<2x64xf32> to vector<2x64xbf16>
    %cst_26 = arith.constant dense<0.000000e+00> : vector<2x128xf32>
    %92 = tpu.matmul %91, %4, %cst_26 {dimension_numbers = #tpu.dot_dimension_numbers<[1], [0], [0], [1], [0, 0, 1, 1], [], []>} : vector<2x64xbf16>, vector<64x128xbf16>, vector<2x128xf32> -> vector<2x128xf32>
    %93 = vector.extract_strided_slice %92 {offsets = [0, 0], sizes = [2, 64], strides = [1, 1]} : vector<2x128xf32> to vector<2x64xf32>
    %94 = vector.broadcast %5 : vector<1x64xf32> to vector<2x64xf32>
    %95 = arith.addf %93, %94 : vector<2x64xf32>
    %96 = arith.negf %95 : vector<2x64xf32>
    %97 = math.exp %96 : vector<2x64xf32>
    %cst_27 = arith.constant 1.000000e+00 : f32
    %98 = vector.broadcast %cst_27 : f32 to vector<2x64xf32>
    %99 = arith.addf %98, %97 : vector<2x64xf32>
    %100 = arith.divf %98, %99 : vector<2x64xf32>
    %101 = vector.extract_strided_slice %100 {offsets = [0, 0], sizes = [2, 32], strides = [1, 1]} : vector<2x64xf32> to vector<2x32xf32>
    %102 = vector.extract_strided_slice %100 {offsets = [0, 32], sizes = [2, 32], strides = [1, 1]} : vector<2x64xf32> to vector<2x32xf32>
    %103 = vector.extract_strided_slice %92 {offsets = [0, 64], sizes = [2, 32], strides = [1, 1]} : vector<2x128xf32> to vector<2x32xf32>
    %104 = vector.broadcast %6 : vector<1x32xf32> to vector<2x32xf32>
    %105 = arith.addf %103, %104 : vector<2x32xf32>
    %106 = vector.extract_strided_slice %92 {offsets = [0, 96], sizes = [2, 32], strides = [1, 1]} : vector<2x128xf32> to vector<2x32xf32>
    %107 = vector.broadcast %7 : vector<1x32xf32> to vector<2x32xf32>
    %108 = arith.addf %106, %107 : vector<2x32xf32>
    %109 = arith.mulf %101, %108 : vector<2x32xf32>
    %110 = arith.addf %105, %109 : vector<2x32xf32>
    %111 = math.tanh %110 : vector<2x32xf32>
    %112 = arith.subf %65, %111 : vector<2x32xf32>
    %113 = arith.mulf %102, %112 : vector<2x32xf32>
    %114 = arith.addf %111, %113 : vector<2x32xf32>
    %115 = vector.extract_strided_slice %14 {offsets = [0, 2, 0], sizes = [2, 1, 96], strides = [1, 1, 1]} : vector<2x8x96xf32> to vector<2x1x96xf32>
    %116 = vector.shape_cast %115 : vector<2x1x96xf32> to vector<2x96xf32>
    %117 = arith.truncf %89 : vector<2x32xf32> to vector<2x32xbf16>
    %cst_28 = arith.constant dense<0.000000e+00> : vector<2x96xf32>
    %118 = tpu.matmul %117, %1, %cst_28 {dimension_numbers = #tpu.dot_dimension_numbers<[1], [0], [0], [1], [0, 0, 1, 1], [], []>} : vector<2x32xbf16>, vector<32x96xbf16>, vector<2x96xf32> -> vector<2x96xf32>
    %119 = vector.extract_strided_slice %116 {offsets = [0, 0], sizes = [2, 64], strides = [1, 1]} : vector<2x96xf32> to vector<2x64xf32>
    %120 = vector.extract_strided_slice %118 {offsets = [0, 0], sizes = [2, 64], strides = [1, 1]} : vector<2x96xf32> to vector<2x64xf32>
    %121 = arith.addf %119, %120 : vector<2x64xf32>
    %122 = arith.negf %121 : vector<2x64xf32>
    %123 = math.exp %122 : vector<2x64xf32>
    %cst_29 = arith.constant 1.000000e+00 : f32
    %124 = vector.broadcast %cst_29 : f32 to vector<2x64xf32>
    %125 = arith.addf %124, %123 : vector<2x64xf32>
    %126 = arith.divf %124, %125 : vector<2x64xf32>
    %127 = vector.extract_strided_slice %126 {offsets = [0, 0], sizes = [2, 32], strides = [1, 1]} : vector<2x64xf32> to vector<2x32xf32>
    %128 = vector.extract_strided_slice %126 {offsets = [0, 32], sizes = [2, 32], strides = [1, 1]} : vector<2x64xf32> to vector<2x32xf32>
    %129 = vector.extract_strided_slice %116 {offsets = [0, 64], sizes = [2, 32], strides = [1, 1]} : vector<2x96xf32> to vector<2x32xf32>
    %130 = vector.extract_strided_slice %118 {offsets = [0, 64], sizes = [2, 32], strides = [1, 1]} : vector<2x96xf32> to vector<2x32xf32>
    %131 = vector.broadcast %3 : vector<1x32xf32> to vector<2x32xf32>
    %132 = arith.addf %130, %131 : vector<2x32xf32>
    %133 = arith.mulf %127, %132 : vector<2x32xf32>
    %134 = arith.addf %129, %133 : vector<2x32xf32>
    %135 = math.tanh %134 : vector<2x32xf32>
    %136 = arith.subf %89, %135 : vector<2x32xf32>
    %137 = arith.mulf %128, %136 : vector<2x32xf32>
    %138 = arith.addf %135, %137 : vector<2x32xf32>
    %139 = tpu.concatenate %138, %114 in 1 : vector<2x32xf32>, vector<2x32xf32> -> vector<2x64xf32>
    %140 = arith.truncf %139 : vector<2x64xf32> to vector<2x64xbf16>
    %cst_30 = arith.constant dense<0.000000e+00> : vector<2x128xf32>
    %141 = tpu.matmul %140, %4, %cst_30 {dimension_numbers = #tpu.dot_dimension_numbers<[1], [0], [0], [1], [0, 0, 1, 1], [], []>} : vector<2x64xbf16>, vector<64x128xbf16>, vector<2x128xf32> -> vector<2x128xf32>
    %142 = vector.extract_strided_slice %141 {offsets = [0, 0], sizes = [2, 64], strides = [1, 1]} : vector<2x128xf32> to vector<2x64xf32>
    %143 = vector.broadcast %5 : vector<1x64xf32> to vector<2x64xf32>
    %144 = arith.addf %142, %143 : vector<2x64xf32>
    %145 = arith.negf %144 : vector<2x64xf32>
    %146 = math.exp %145 : vector<2x64xf32>
    %cst_31 = arith.constant 1.000000e+00 : f32
    %147 = vector.broadcast %cst_31 : f32 to vector<2x64xf32>
    %148 = arith.addf %147, %146 : vector<2x64xf32>
    %149 = arith.divf %147, %148 : vector<2x64xf32>
    %150 = vector.extract_strided_slice %149 {offsets = [0, 0], sizes = [2, 32], strides = [1, 1]} : vector<2x64xf32> to vector<2x32xf32>
    %151 = vector.extract_strided_slice %149 {offsets = [0, 32], sizes = [2, 32], strides = [1, 1]} : vector<2x64xf32> to vector<2x32xf32>
    %152 = vector.extract_strided_slice %141 {offsets = [0, 64], sizes = [2, 32], strides = [1, 1]} : vector<2x128xf32> to vector<2x32xf32>
    %153 = vector.broadcast %6 : vector<1x32xf32> to vector<2x32xf32>
    %154 = arith.addf %152, %153 : vector<2x32xf32>
    %155 = vector.extract_strided_slice %141 {offsets = [0, 96], sizes = [2, 32], strides = [1, 1]} : vector<2x128xf32> to vector<2x32xf32>
    %156 = vector.broadcast %7 : vector<1x32xf32> to vector<2x32xf32>
    %157 = arith.addf %155, %156 : vector<2x32xf32>
    %158 = arith.mulf %150, %157 : vector<2x32xf32>
    %159 = arith.addf %154, %158 : vector<2x32xf32>
    %160 = math.tanh %159 : vector<2x32xf32>
    %161 = arith.subf %114, %160 : vector<2x32xf32>
    %162 = arith.mulf %151, %161 : vector<2x32xf32>
    %163 = arith.addf %160, %162 : vector<2x32xf32>
    %164 = vector.extract_strided_slice %14 {offsets = [0, 3, 0], sizes = [2, 1, 96], strides = [1, 1, 1]} : vector<2x8x96xf32> to vector<2x1x96xf32>
    %165 = vector.shape_cast %164 : vector<2x1x96xf32> to vector<2x96xf32>
    %166 = arith.truncf %138 : vector<2x32xf32> to vector<2x32xbf16>
    %cst_32 = arith.constant dense<0.000000e+00> : vector<2x96xf32>
    %167 = tpu.matmul %166, %1, %cst_32 {dimension_numbers = #tpu.dot_dimension_numbers<[1], [0], [0], [1], [0, 0, 1, 1], [], []>} : vector<2x32xbf16>, vector<32x96xbf16>, vector<2x96xf32> -> vector<2x96xf32>
    %168 = vector.extract_strided_slice %165 {offsets = [0, 0], sizes = [2, 64], strides = [1, 1]} : vector<2x96xf32> to vector<2x64xf32>
    %169 = vector.extract_strided_slice %167 {offsets = [0, 0], sizes = [2, 64], strides = [1, 1]} : vector<2x96xf32> to vector<2x64xf32>
    %170 = arith.addf %168, %169 : vector<2x64xf32>
    %171 = arith.negf %170 : vector<2x64xf32>
    %172 = math.exp %171 : vector<2x64xf32>
    %cst_33 = arith.constant 1.000000e+00 : f32
    %173 = vector.broadcast %cst_33 : f32 to vector<2x64xf32>
    %174 = arith.addf %173, %172 : vector<2x64xf32>
    %175 = arith.divf %173, %174 : vector<2x64xf32>
    %176 = vector.extract_strided_slice %175 {offsets = [0, 0], sizes = [2, 32], strides = [1, 1]} : vector<2x64xf32> to vector<2x32xf32>
    %177 = vector.extract_strided_slice %175 {offsets = [0, 32], sizes = [2, 32], strides = [1, 1]} : vector<2x64xf32> to vector<2x32xf32>
    %178 = vector.extract_strided_slice %165 {offsets = [0, 64], sizes = [2, 32], strides = [1, 1]} : vector<2x96xf32> to vector<2x32xf32>
    %179 = vector.extract_strided_slice %167 {offsets = [0, 64], sizes = [2, 32], strides = [1, 1]} : vector<2x96xf32> to vector<2x32xf32>
    %180 = vector.broadcast %3 : vector<1x32xf32> to vector<2x32xf32>
    %181 = arith.addf %179, %180 : vector<2x32xf32>
    %182 = arith.mulf %176, %181 : vector<2x32xf32>
    %183 = arith.addf %178, %182 : vector<2x32xf32>
    %184 = math.tanh %183 : vector<2x32xf32>
    %185 = arith.subf %138, %184 : vector<2x32xf32>
    %186 = arith.mulf %177, %185 : vector<2x32xf32>
    %187 = arith.addf %184, %186 : vector<2x32xf32>
    %188 = tpu.concatenate %187, %163 in 1 : vector<2x32xf32>, vector<2x32xf32> -> vector<2x64xf32>
    %189 = arith.truncf %188 : vector<2x64xf32> to vector<2x64xbf16>
    %cst_34 = arith.constant dense<0.000000e+00> : vector<2x128xf32>
    %190 = tpu.matmul %189, %4, %cst_34 {dimension_numbers = #tpu.dot_dimension_numbers<[1], [0], [0], [1], [0, 0, 1, 1], [], []>} : vector<2x64xbf16>, vector<64x128xbf16>, vector<2x128xf32> -> vector<2x128xf32>
    %191 = vector.extract_strided_slice %190 {offsets = [0, 0], sizes = [2, 64], strides = [1, 1]} : vector<2x128xf32> to vector<2x64xf32>
    %192 = vector.broadcast %5 : vector<1x64xf32> to vector<2x64xf32>
    %193 = arith.addf %191, %192 : vector<2x64xf32>
    %194 = arith.negf %193 : vector<2x64xf32>
    %195 = math.exp %194 : vector<2x64xf32>
    %cst_35 = arith.constant 1.000000e+00 : f32
    %196 = vector.broadcast %cst_35 : f32 to vector<2x64xf32>
    %197 = arith.addf %196, %195 : vector<2x64xf32>
    %198 = arith.divf %196, %197 : vector<2x64xf32>
    %199 = vector.extract_strided_slice %198 {offsets = [0, 0], sizes = [2, 32], strides = [1, 1]} : vector<2x64xf32> to vector<2x32xf32>
    %200 = vector.extract_strided_slice %198 {offsets = [0, 32], sizes = [2, 32], strides = [1, 1]} : vector<2x64xf32> to vector<2x32xf32>
    %201 = vector.extract_strided_slice %190 {offsets = [0, 64], sizes = [2, 32], strides = [1, 1]} : vector<2x128xf32> to vector<2x32xf32>
    %202 = vector.broadcast %6 : vector<1x32xf32> to vector<2x32xf32>
    %203 = arith.addf %201, %202 : vector<2x32xf32>
    %204 = vector.extract_strided_slice %190 {offsets = [0, 96], sizes = [2, 32], strides = [1, 1]} : vector<2x128xf32> to vector<2x32xf32>
    %205 = vector.broadcast %7 : vector<1x32xf32> to vector<2x32xf32>
    %206 = arith.addf %204, %205 : vector<2x32xf32>
    %207 = arith.mulf %199, %206 : vector<2x32xf32>
    %208 = arith.addf %203, %207 : vector<2x32xf32>
    %209 = math.tanh %208 : vector<2x32xf32>
    %210 = arith.subf %163, %209 : vector<2x32xf32>
    %211 = arith.mulf %200, %210 : vector<2x32xf32>
    %212 = arith.addf %209, %211 : vector<2x32xf32>
    %213 = vector.extract_strided_slice %14 {offsets = [0, 4, 0], sizes = [2, 1, 96], strides = [1, 1, 1]} : vector<2x8x96xf32> to vector<2x1x96xf32>
    %214 = vector.shape_cast %213 : vector<2x1x96xf32> to vector<2x96xf32>
    %215 = arith.truncf %187 : vector<2x32xf32> to vector<2x32xbf16>
    %cst_36 = arith.constant dense<0.000000e+00> : vector<2x96xf32>
    %216 = tpu.matmul %215, %1, %cst_36 {dimension_numbers = #tpu.dot_dimension_numbers<[1], [0], [0], [1], [0, 0, 1, 1], [], []>} : vector<2x32xbf16>, vector<32x96xbf16>, vector<2x96xf32> -> vector<2x96xf32>
    %217 = vector.extract_strided_slice %214 {offsets = [0, 0], sizes = [2, 64], strides = [1, 1]} : vector<2x96xf32> to vector<2x64xf32>
    %218 = vector.extract_strided_slice %216 {offsets = [0, 0], sizes = [2, 64], strides = [1, 1]} : vector<2x96xf32> to vector<2x64xf32>
    %219 = arith.addf %217, %218 : vector<2x64xf32>
    %220 = arith.negf %219 : vector<2x64xf32>
    %221 = math.exp %220 : vector<2x64xf32>
    %cst_37 = arith.constant 1.000000e+00 : f32
    %222 = vector.broadcast %cst_37 : f32 to vector<2x64xf32>
    %223 = arith.addf %222, %221 : vector<2x64xf32>
    %224 = arith.divf %222, %223 : vector<2x64xf32>
    %225 = vector.extract_strided_slice %224 {offsets = [0, 0], sizes = [2, 32], strides = [1, 1]} : vector<2x64xf32> to vector<2x32xf32>
    %226 = vector.extract_strided_slice %224 {offsets = [0, 32], sizes = [2, 32], strides = [1, 1]} : vector<2x64xf32> to vector<2x32xf32>
    %227 = vector.extract_strided_slice %214 {offsets = [0, 64], sizes = [2, 32], strides = [1, 1]} : vector<2x96xf32> to vector<2x32xf32>
    %228 = vector.extract_strided_slice %216 {offsets = [0, 64], sizes = [2, 32], strides = [1, 1]} : vector<2x96xf32> to vector<2x32xf32>
    %229 = vector.broadcast %3 : vector<1x32xf32> to vector<2x32xf32>
    %230 = arith.addf %228, %229 : vector<2x32xf32>
    %231 = arith.mulf %225, %230 : vector<2x32xf32>
    %232 = arith.addf %227, %231 : vector<2x32xf32>
    %233 = math.tanh %232 : vector<2x32xf32>
    %234 = arith.subf %187, %233 : vector<2x32xf32>
    %235 = arith.mulf %226, %234 : vector<2x32xf32>
    %236 = arith.addf %233, %235 : vector<2x32xf32>
    %237 = tpu.concatenate %236, %212 in 1 : vector<2x32xf32>, vector<2x32xf32> -> vector<2x64xf32>
    %238 = arith.truncf %237 : vector<2x64xf32> to vector<2x64xbf16>
    %cst_38 = arith.constant dense<0.000000e+00> : vector<2x128xf32>
    %239 = tpu.matmul %238, %4, %cst_38 {dimension_numbers = #tpu.dot_dimension_numbers<[1], [0], [0], [1], [0, 0, 1, 1], [], []>} : vector<2x64xbf16>, vector<64x128xbf16>, vector<2x128xf32> -> vector<2x128xf32>
    %240 = vector.extract_strided_slice %239 {offsets = [0, 0], sizes = [2, 64], strides = [1, 1]} : vector<2x128xf32> to vector<2x64xf32>
    %241 = vector.broadcast %5 : vector<1x64xf32> to vector<2x64xf32>
    %242 = arith.addf %240, %241 : vector<2x64xf32>
    %243 = arith.negf %242 : vector<2x64xf32>
    %244 = math.exp %243 : vector<2x64xf32>
    %cst_39 = arith.constant 1.000000e+00 : f32
    %245 = vector.broadcast %cst_39 : f32 to vector<2x64xf32>
    %246 = arith.addf %245, %244 : vector<2x64xf32>
    %247 = arith.divf %245, %246 : vector<2x64xf32>
    %248 = vector.extract_strided_slice %247 {offsets = [0, 0], sizes = [2, 32], strides = [1, 1]} : vector<2x64xf32> to vector<2x32xf32>
    %249 = vector.extract_strided_slice %247 {offsets = [0, 32], sizes = [2, 32], strides = [1, 1]} : vector<2x64xf32> to vector<2x32xf32>
    %250 = vector.extract_strided_slice %239 {offsets = [0, 64], sizes = [2, 32], strides = [1, 1]} : vector<2x128xf32> to vector<2x32xf32>
    %251 = vector.broadcast %6 : vector<1x32xf32> to vector<2x32xf32>
    %252 = arith.addf %250, %251 : vector<2x32xf32>
    %253 = vector.extract_strided_slice %239 {offsets = [0, 96], sizes = [2, 32], strides = [1, 1]} : vector<2x128xf32> to vector<2x32xf32>
    %254 = vector.broadcast %7 : vector<1x32xf32> to vector<2x32xf32>
    %255 = arith.addf %253, %254 : vector<2x32xf32>
    %256 = arith.mulf %248, %255 : vector<2x32xf32>
    %257 = arith.addf %252, %256 : vector<2x32xf32>
    %258 = math.tanh %257 : vector<2x32xf32>
    %259 = arith.subf %212, %258 : vector<2x32xf32>
    %260 = arith.mulf %249, %259 : vector<2x32xf32>
    %261 = arith.addf %258, %260 : vector<2x32xf32>
    %262 = vector.extract_strided_slice %14 {offsets = [0, 5, 0], sizes = [2, 1, 96], strides = [1, 1, 1]} : vector<2x8x96xf32> to vector<2x1x96xf32>
    %263 = vector.shape_cast %262 : vector<2x1x96xf32> to vector<2x96xf32>
    %264 = arith.truncf %236 : vector<2x32xf32> to vector<2x32xbf16>
    %cst_40 = arith.constant dense<0.000000e+00> : vector<2x96xf32>
    %265 = tpu.matmul %264, %1, %cst_40 {dimension_numbers = #tpu.dot_dimension_numbers<[1], [0], [0], [1], [0, 0, 1, 1], [], []>} : vector<2x32xbf16>, vector<32x96xbf16>, vector<2x96xf32> -> vector<2x96xf32>
    %266 = vector.extract_strided_slice %263 {offsets = [0, 0], sizes = [2, 64], strides = [1, 1]} : vector<2x96xf32> to vector<2x64xf32>
    %267 = vector.extract_strided_slice %265 {offsets = [0, 0], sizes = [2, 64], strides = [1, 1]} : vector<2x96xf32> to vector<2x64xf32>
    %268 = arith.addf %266, %267 : vector<2x64xf32>
    %269 = arith.negf %268 : vector<2x64xf32>
    %270 = math.exp %269 : vector<2x64xf32>
    %cst_41 = arith.constant 1.000000e+00 : f32
    %271 = vector.broadcast %cst_41 : f32 to vector<2x64xf32>
    %272 = arith.addf %271, %270 : vector<2x64xf32>
    %273 = arith.divf %271, %272 : vector<2x64xf32>
    %274 = vector.extract_strided_slice %273 {offsets = [0, 0], sizes = [2, 32], strides = [1, 1]} : vector<2x64xf32> to vector<2x32xf32>
    %275 = vector.extract_strided_slice %273 {offsets = [0, 32], sizes = [2, 32], strides = [1, 1]} : vector<2x64xf32> to vector<2x32xf32>
    %276 = vector.extract_strided_slice %263 {offsets = [0, 64], sizes = [2, 32], strides = [1, 1]} : vector<2x96xf32> to vector<2x32xf32>
    %277 = vector.extract_strided_slice %265 {offsets = [0, 64], sizes = [2, 32], strides = [1, 1]} : vector<2x96xf32> to vector<2x32xf32>
    %278 = vector.broadcast %3 : vector<1x32xf32> to vector<2x32xf32>
    %279 = arith.addf %277, %278 : vector<2x32xf32>
    %280 = arith.mulf %274, %279 : vector<2x32xf32>
    %281 = arith.addf %276, %280 : vector<2x32xf32>
    %282 = math.tanh %281 : vector<2x32xf32>
    %283 = arith.subf %236, %282 : vector<2x32xf32>
    %284 = arith.mulf %275, %283 : vector<2x32xf32>
    %285 = arith.addf %282, %284 : vector<2x32xf32>
    %286 = tpu.concatenate %285, %261 in 1 : vector<2x32xf32>, vector<2x32xf32> -> vector<2x64xf32>
    %287 = arith.truncf %286 : vector<2x64xf32> to vector<2x64xbf16>
    %cst_42 = arith.constant dense<0.000000e+00> : vector<2x128xf32>
    %288 = tpu.matmul %287, %4, %cst_42 {dimension_numbers = #tpu.dot_dimension_numbers<[1], [0], [0], [1], [0, 0, 1, 1], [], []>} : vector<2x64xbf16>, vector<64x128xbf16>, vector<2x128xf32> -> vector<2x128xf32>
    %289 = vector.extract_strided_slice %288 {offsets = [0, 0], sizes = [2, 64], strides = [1, 1]} : vector<2x128xf32> to vector<2x64xf32>
    %290 = vector.broadcast %5 : vector<1x64xf32> to vector<2x64xf32>
    %291 = arith.addf %289, %290 : vector<2x64xf32>
    %292 = arith.negf %291 : vector<2x64xf32>
    %293 = math.exp %292 : vector<2x64xf32>
    %cst_43 = arith.constant 1.000000e+00 : f32
    %294 = vector.broadcast %cst_43 : f32 to vector<2x64xf32>
    %295 = arith.addf %294, %293 : vector<2x64xf32>
    %296 = arith.divf %294, %295 : vector<2x64xf32>
    %297 = vector.extract_strided_slice %296 {offsets = [0, 0], sizes = [2, 32], strides = [1, 1]} : vector<2x64xf32> to vector<2x32xf32>
    %298 = vector.extract_strided_slice %296 {offsets = [0, 32], sizes = [2, 32], strides = [1, 1]} : vector<2x64xf32> to vector<2x32xf32>
    %299 = vector.extract_strided_slice %288 {offsets = [0, 64], sizes = [2, 32], strides = [1, 1]} : vector<2x128xf32> to vector<2x32xf32>
    %300 = vector.broadcast %6 : vector<1x32xf32> to vector<2x32xf32>
    %301 = arith.addf %299, %300 : vector<2x32xf32>
    %302 = vector.extract_strided_slice %288 {offsets = [0, 96], sizes = [2, 32], strides = [1, 1]} : vector<2x128xf32> to vector<2x32xf32>
    %303 = vector.broadcast %7 : vector<1x32xf32> to vector<2x32xf32>
    %304 = arith.addf %302, %303 : vector<2x32xf32>
    %305 = arith.mulf %297, %304 : vector<2x32xf32>
    %306 = arith.addf %301, %305 : vector<2x32xf32>
    %307 = math.tanh %306 : vector<2x32xf32>
    %308 = arith.subf %261, %307 : vector<2x32xf32>
    %309 = arith.mulf %298, %308 : vector<2x32xf32>
    %310 = arith.addf %307, %309 : vector<2x32xf32>
    %311 = vector.extract_strided_slice %14 {offsets = [0, 6, 0], sizes = [2, 1, 96], strides = [1, 1, 1]} : vector<2x8x96xf32> to vector<2x1x96xf32>
    %312 = vector.shape_cast %311 : vector<2x1x96xf32> to vector<2x96xf32>
    %313 = arith.truncf %285 : vector<2x32xf32> to vector<2x32xbf16>
    %cst_44 = arith.constant dense<0.000000e+00> : vector<2x96xf32>
    %314 = tpu.matmul %313, %1, %cst_44 {dimension_numbers = #tpu.dot_dimension_numbers<[1], [0], [0], [1], [0, 0, 1, 1], [], []>} : vector<2x32xbf16>, vector<32x96xbf16>, vector<2x96xf32> -> vector<2x96xf32>
    %315 = vector.extract_strided_slice %312 {offsets = [0, 0], sizes = [2, 64], strides = [1, 1]} : vector<2x96xf32> to vector<2x64xf32>
    %316 = vector.extract_strided_slice %314 {offsets = [0, 0], sizes = [2, 64], strides = [1, 1]} : vector<2x96xf32> to vector<2x64xf32>
    %317 = arith.addf %315, %316 : vector<2x64xf32>
    %318 = arith.negf %317 : vector<2x64xf32>
    %319 = math.exp %318 : vector<2x64xf32>
    %cst_45 = arith.constant 1.000000e+00 : f32
    %320 = vector.broadcast %cst_45 : f32 to vector<2x64xf32>
    %321 = arith.addf %320, %319 : vector<2x64xf32>
    %322 = arith.divf %320, %321 : vector<2x64xf32>
    %323 = vector.extract_strided_slice %322 {offsets = [0, 0], sizes = [2, 32], strides = [1, 1]} : vector<2x64xf32> to vector<2x32xf32>
    %324 = vector.extract_strided_slice %322 {offsets = [0, 32], sizes = [2, 32], strides = [1, 1]} : vector<2x64xf32> to vector<2x32xf32>
    %325 = vector.extract_strided_slice %312 {offsets = [0, 64], sizes = [2, 32], strides = [1, 1]} : vector<2x96xf32> to vector<2x32xf32>
    %326 = vector.extract_strided_slice %314 {offsets = [0, 64], sizes = [2, 32], strides = [1, 1]} : vector<2x96xf32> to vector<2x32xf32>
    %327 = vector.broadcast %3 : vector<1x32xf32> to vector<2x32xf32>
    %328 = arith.addf %326, %327 : vector<2x32xf32>
    %329 = arith.mulf %323, %328 : vector<2x32xf32>
    %330 = arith.addf %325, %329 : vector<2x32xf32>
    %331 = math.tanh %330 : vector<2x32xf32>
    %332 = arith.subf %285, %331 : vector<2x32xf32>
    %333 = arith.mulf %324, %332 : vector<2x32xf32>
    %334 = arith.addf %331, %333 : vector<2x32xf32>
    %335 = tpu.concatenate %334, %310 in 1 : vector<2x32xf32>, vector<2x32xf32> -> vector<2x64xf32>
    %336 = arith.truncf %335 : vector<2x64xf32> to vector<2x64xbf16>
    %cst_46 = arith.constant dense<0.000000e+00> : vector<2x128xf32>
    %337 = tpu.matmul %336, %4, %cst_46 {dimension_numbers = #tpu.dot_dimension_numbers<[1], [0], [0], [1], [0, 0, 1, 1], [], []>} : vector<2x64xbf16>, vector<64x128xbf16>, vector<2x128xf32> -> vector<2x128xf32>
    %338 = vector.extract_strided_slice %337 {offsets = [0, 0], sizes = [2, 64], strides = [1, 1]} : vector<2x128xf32> to vector<2x64xf32>
    %339 = vector.broadcast %5 : vector<1x64xf32> to vector<2x64xf32>
    %340 = arith.addf %338, %339 : vector<2x64xf32>
    %341 = arith.negf %340 : vector<2x64xf32>
    %342 = math.exp %341 : vector<2x64xf32>
    %cst_47 = arith.constant 1.000000e+00 : f32
    %343 = vector.broadcast %cst_47 : f32 to vector<2x64xf32>
    %344 = arith.addf %343, %342 : vector<2x64xf32>
    %345 = arith.divf %343, %344 : vector<2x64xf32>
    %346 = vector.extract_strided_slice %345 {offsets = [0, 0], sizes = [2, 32], strides = [1, 1]} : vector<2x64xf32> to vector<2x32xf32>
    %347 = vector.extract_strided_slice %345 {offsets = [0, 32], sizes = [2, 32], strides = [1, 1]} : vector<2x64xf32> to vector<2x32xf32>
    %348 = vector.extract_strided_slice %337 {offsets = [0, 64], sizes = [2, 32], strides = [1, 1]} : vector<2x128xf32> to vector<2x32xf32>
    %349 = vector.broadcast %6 : vector<1x32xf32> to vector<2x32xf32>
    %350 = arith.addf %348, %349 : vector<2x32xf32>
    %351 = vector.extract_strided_slice %337 {offsets = [0, 96], sizes = [2, 32], strides = [1, 1]} : vector<2x128xf32> to vector<2x32xf32>
    %352 = vector.broadcast %7 : vector<1x32xf32> to vector<2x32xf32>
    %353 = arith.addf %351, %352 : vector<2x32xf32>
    %354 = arith.mulf %346, %353 : vector<2x32xf32>
    %355 = arith.addf %350, %354 : vector<2x32xf32>
    %356 = math.tanh %355 : vector<2x32xf32>
    %357 = arith.subf %310, %356 : vector<2x32xf32>
    %358 = arith.mulf %347, %357 : vector<2x32xf32>
    %359 = arith.addf %356, %358 : vector<2x32xf32>
    %360 = vector.extract_strided_slice %14 {offsets = [0, 7, 0], sizes = [2, 1, 96], strides = [1, 1, 1]} : vector<2x8x96xf32> to vector<2x1x96xf32>
    %361 = vector.shape_cast %360 : vector<2x1x96xf32> to vector<2x96xf32>
    %362 = arith.truncf %334 : vector<2x32xf32> to vector<2x32xbf16>
    %cst_48 = arith.constant dense<0.000000e+00> : vector<2x96xf32>
    %363 = tpu.matmul %362, %1, %cst_48 {dimension_numbers = #tpu.dot_dimension_numbers<[1], [0], [0], [1], [0, 0, 1, 1], [], []>} : vector<2x32xbf16>, vector<32x96xbf16>, vector<2x96xf32> -> vector<2x96xf32>
    %364 = vector.extract_strided_slice %361 {offsets = [0, 0], sizes = [2, 64], strides = [1, 1]} : vector<2x96xf32> to vector<2x64xf32>
    %365 = vector.extract_strided_slice %363 {offsets = [0, 0], sizes = [2, 64], strides = [1, 1]} : vector<2x96xf32> to vector<2x64xf32>
    %366 = arith.addf %364, %365 : vector<2x64xf32>
    %367 = arith.negf %366 : vector<2x64xf32>
    %368 = math.exp %367 : vector<2x64xf32>
    %cst_49 = arith.constant 1.000000e+00 : f32
    %369 = vector.broadcast %cst_49 : f32 to vector<2x64xf32>
    %370 = arith.addf %369, %368 : vector<2x64xf32>
    %371 = arith.divf %369, %370 : vector<2x64xf32>
    %372 = vector.extract_strided_slice %371 {offsets = [0, 0], sizes = [2, 32], strides = [1, 1]} : vector<2x64xf32> to vector<2x32xf32>
    %373 = vector.extract_strided_slice %371 {offsets = [0, 32], sizes = [2, 32], strides = [1, 1]} : vector<2x64xf32> to vector<2x32xf32>
    %374 = vector.extract_strided_slice %361 {offsets = [0, 64], sizes = [2, 32], strides = [1, 1]} : vector<2x96xf32> to vector<2x32xf32>
    %375 = vector.extract_strided_slice %363 {offsets = [0, 64], sizes = [2, 32], strides = [1, 1]} : vector<2x96xf32> to vector<2x32xf32>
    %376 = vector.broadcast %3 : vector<1x32xf32> to vector<2x32xf32>
    %377 = arith.addf %375, %376 : vector<2x32xf32>
    %378 = arith.mulf %372, %377 : vector<2x32xf32>
    %379 = arith.addf %374, %378 : vector<2x32xf32>
    %380 = math.tanh %379 : vector<2x32xf32>
    %381 = arith.subf %334, %380 : vector<2x32xf32>
    %382 = arith.mulf %373, %381 : vector<2x32xf32>
    %383 = arith.addf %380, %382 : vector<2x32xf32>
    %384 = tpu.concatenate %383, %359 in 1 : vector<2x32xf32>, vector<2x32xf32> -> vector<2x64xf32>
    %385 = arith.truncf %384 : vector<2x64xf32> to vector<2x64xbf16>
    %cst_50 = arith.constant dense<0.000000e+00> : vector<2x128xf32>
    %386 = tpu.matmul %385, %4, %cst_50 {dimension_numbers = #tpu.dot_dimension_numbers<[1], [0], [0], [1], [0, 0, 1, 1], [], []>} : vector<2x64xbf16>, vector<64x128xbf16>, vector<2x128xf32> -> vector<2x128xf32>
    %387 = vector.extract_strided_slice %386 {offsets = [0, 0], sizes = [2, 64], strides = [1, 1]} : vector<2x128xf32> to vector<2x64xf32>
    %388 = vector.broadcast %5 : vector<1x64xf32> to vector<2x64xf32>
    %389 = arith.addf %387, %388 : vector<2x64xf32>
    %390 = arith.negf %389 : vector<2x64xf32>
    %391 = math.exp %390 : vector<2x64xf32>
    %cst_51 = arith.constant 1.000000e+00 : f32
    %392 = vector.broadcast %cst_51 : f32 to vector<2x64xf32>
    %393 = arith.addf %392, %391 : vector<2x64xf32>
    %394 = arith.divf %392, %393 : vector<2x64xf32>
    %395 = vector.extract_strided_slice %394 {offsets = [0, 0], sizes = [2, 32], strides = [1, 1]} : vector<2x64xf32> to vector<2x32xf32>
    %396 = vector.extract_strided_slice %394 {offsets = [0, 32], sizes = [2, 32], strides = [1, 1]} : vector<2x64xf32> to vector<2x32xf32>
    %397 = vector.extract_strided_slice %386 {offsets = [0, 64], sizes = [2, 32], strides = [1, 1]} : vector<2x128xf32> to vector<2x32xf32>
    %398 = vector.broadcast %6 : vector<1x32xf32> to vector<2x32xf32>
    %399 = arith.addf %397, %398 : vector<2x32xf32>
    %400 = vector.extract_strided_slice %386 {offsets = [0, 96], sizes = [2, 32], strides = [1, 1]} : vector<2x128xf32> to vector<2x32xf32>
    %401 = vector.broadcast %7 : vector<1x32xf32> to vector<2x32xf32>
    %402 = arith.addf %400, %401 : vector<2x32xf32>
    %403 = arith.mulf %395, %402 : vector<2x32xf32>
    %404 = arith.addf %399, %403 : vector<2x32xf32>
    %405 = math.tanh %404 : vector<2x32xf32>
    %406 = arith.subf %359, %405 : vector<2x32xf32>
    %407 = arith.mulf %396, %406 : vector<2x32xf32>
    %408 = arith.addf %405, %407 : vector<2x32xf32>
    %c0_52 = arith.constant 0 : index
    %c0_53 = arith.constant 0 : index
    %409 = vector.load %arg10[%c0_52, %c0_53] : memref<32x8xf32, #tpu.memory_space<vmem>>, vector<32x8xf32>
    %cst_54 = arith.constant dense<0.000000e+00> : vector<2x8xf32>
    %410 = tpu.matmul %408, %409, %cst_54 {dimension_numbers = #tpu.dot_dimension_numbers<[1], [0], [0], [1], [0, 0, 1, 1], [], []>} : vector<2x32xf32>, vector<32x8xf32>, vector<2x8xf32> -> vector<2x8xf32>
    %c0_55 = arith.constant 0 : index
    %c0_56 = arith.constant 0 : index
    %411 = vector.load %arg11[%c0_55, %c0_56] : memref<1x8xf32, #tpu.memory_space<vmem>>, vector<1x8xf32>
    %412 = vector.broadcast %411 : vector<1x8xf32> to vector<2x8xf32>
    %413 = arith.addf %410, %412 : vector<2x8xf32>
    %c0_57 = arith.constant 0 : index
    %c0_58 = arith.constant 0 : index
    %414 = vector.load %arg12[%c0_57, %c0_58] : memref<2x8xf32, #tpu.memory_space<vmem>>, vector<2x8xf32>
    tpu.vector_store %arg12[%c0_57, %c0_58], %413 {strides = array<i32>} : memref<2x8xf32, #tpu.memory_space<vmem>>, vector<2x8xf32>,
    return
  }
  func.func @transform_0(%arg0: i32) -> (i32, i32, i32) {
    %c0_i32 = arith.constant 0 : i32
    %c0_i32_0 = arith.constant 0 : i32
    %c0_i32_1 = arith.constant 0 : i32
    return %arg0, %c0_i32, %c0_i32_0 : i32, i32, i32
  }
  func.func @transform_1(%arg0: i32) -> (i32, i32) {
    %c0_i32 = arith.constant 0 : i32
    %c0_i32_0 = arith.constant 0 : i32
    %c0_i32_1 = arith.constant 0 : i32
    return %c0_i32, %c0_i32_0 : i32, i32
  }
  func.func @transform_2(%arg0: i32) -> (i32, i32) {
    %c0_i32 = arith.constant 0 : i32
    %c0_i32_0 = arith.constant 0 : i32
    %c0_i32_1 = arith.constant 0 : i32
    return %c0_i32, %c0_i32_0 : i32, i32
  }
  func.func @transform_3(%arg0: i32) -> (i32, i32) {
    %c0_i32 = arith.constant 0 : i32
    %c0_i32_0 = arith.constant 0 : i32
    %c0_i32_1 = arith.constant 0 : i32
    return %c0_i32, %c0_i32_0 : i32, i32
  }
  func.func @transform_4(%arg0: i32) -> (i32, i32) {
    %c0_i32 = arith.constant 0 : i32
    %c0_i32_0 = arith.constant 0 : i32
    %c0_i32_1 = arith.constant 0 : i32
    return %c0_i32, %c0_i32_0 : i32, i32
  }
  func.func @transform_5(%arg0: i32) -> (i32, i32) {
    %c0_i32 = arith.constant 0 : i32
    %c0_i32_0 = arith.constant 0 : i32
    %c0_i32_1 = arith.constant 0 : i32
    return %c0_i32, %c0_i32_0 : i32, i32
  }
  func.func @transform_6(%arg0: i32) -> (i32, i32) {
    %c0_i32 = arith.constant 0 : i32
    %c0_i32_0 = arith.constant 0 : i32
    %c0_i32_1 = arith.constant 0 : i32
    return %c0_i32, %c0_i32_0 : i32, i32
  }
  func.func @transform_7(%arg0: i32) -> (i32, i32) {
    %c0_i32 = arith.constant 0 : i32
    %c0_i32_0 = arith.constant 0 : i32
    %c0_i32_1 = arith.constant 0 : i32
    return %c0_i32, %c0_i32_0 : i32, i32
  }
  func.func @transform_8(%arg0: i32) -> (i32, i32) {
    %c0_i32 = arith.constant 0 : i32
    %c0_i32_0 = arith.constant 0 : i32
    %c0_i32_1 = arith.constant 0 : i32
    return %c0_i32, %c0_i32_0 : i32, i32
  }
  func.func @transform_9(%arg0: i32) -> (i32, i32) {
    %c0_i32 = arith.constant 0 : i32
    %c0_i32_0 = arith.constant 0 : i32
    %c0_i32_1 = arith.constant 0 : i32
    return %c0_i32, %c0_i32_0 : i32, i32
  }
  func.func @transform_10(%arg0: i32) -> (i32, i32) {
    %c0_i32 = arith.constant 0 : i32
    %c0_i32_0 = arith.constant 0 : i32
    %c0_i32_1 = arith.constant 0 : i32
    return %c0_i32, %c0_i32_0 : i32, i32
  }
  func.func @transform_11(%arg0: i32) -> (i32, i32) {
    %c0_i32 = arith.constant 0 : i32
    %c0_i32_0 = arith.constant 0 : i32
    return %arg0, %c0_i32 : i32, i32
  }
}

</mosaic_0001>

<bundles_post_ra>
// kernel: tpu_custom_call.1
= control target key start
LH: loop header
LB: loop body
LE: loop exit
PB: predicated region body
PF: predicated region fallthrough
CT: control target
= control target key end

     0   :  { %16 = vsyncpa [#allocation3], 0  ;;  %s3341_s0 = inlined_call_operand.vmem [shape: f32[2,8,16], index: 0, kind: input, shape index: {}]   ;;  %s3342_s1 = inlined_call_operand.vmem [shape: bf16[16,96], index: 1, kind: input, shape index: {}]   ;;  %s3343_s2 = inlined_call_operand.hbm [shape: bf16[32,96], index: 2, kind: input, shape index: {}]   ;;  %s3344_s3 = inlined_call_operand.vmem [shape: f32[1,96], index: 3, kind: input, shape index: {}]   ;;  %s3345_s4 = inlined_call_operand.vmem [shape: f32[1,32], index: 4, kind: input, shape index: {}]   ;;  %s3346_s5 = inlined_call_operand.vmem [shape: bf16[64,128], index: 5, kind: input, shape index: {}]   ;;  %s3347_s6 = inlined_call_operand.hbm [shape: f32[1,64], index: 6, kind: input, shape index: {}]   ;;  %s3348_s7 = inlined_call_operand.hbm [shape: f32[1,32], index: 7, kind: input, shape index: {}]   ;;  %s3349_s8 = inlined_call_operand.vmem [shape: f32[1,32], index: 8, kind: input, shape index: {}]   ;;  %s3350_s9 = inlined_call_operand.vmem [shape: f32[32,8], index: 9, kind: input, shape index: {}]   ;;  %s3351_s10 = inlined_call_operand.vmem [shape: f32[1,8], index: 10, kind: input, shape index: {}]   ;;  %s3352_s11 = inlined_call_operand.hbm [shape: f32[2,8], index: 11, kind: output, shape index: {}]  }
   0x1   :  { %17 = vsyncpa [#allocation6], 0 }
   0x2   :  { %18 = vsyncpa [#allocation4], 0  ;;  %s2657_s17 = smov [#allocation5]   ;;  %s2658_s19 = smov [#allocation2]  }
   0x3   :  { %s47_s18 = sshll.u32 %s2657_s17, 4  ;;  %s28_s20 = sshll.u32 %s2658_s19, 4  ;;  %s48_s18 = int_to_ptr.vmem [resolvable:$true] %s47_s18  ;;  %s2729_s20 = int_to_ptr.vmem [resolvable:$true] %s28_s20 }
   0x4   :  { %s2563_s23 = scalar_lea.hbm %s3347_s6, 16 }
   0x5   :  { %p2564_p0 = scmp.ne.s32.totalorder %s3347_s6, %s2563_s23  ;;  %p2567_p1 = scmp.lt.u32.totalorder %s2563_s23, %s3347_s6 }
   0x7   :  { %p2569_p2 = pnand %p2567_p1, %p2564_p0 }
   0x9   :  { %2572 = shalt.err (!%p2569_p2)
}
   0xa   :  { %s2573_s28 = scalar_lea.vmem %s48_s18, 16  ;;  %s2577_s29 = scalar_lea.vmem %s48_s18, 32 }
   0xb   :  { %p2574_p3 = scmp.ne.s32.totalorder %s48_s18, %s2573_s28  ;;  %p2578_p4 = scmp.lt.s32.totalorder %s48_s18, %s48_s18 }
   0xc   :  { %p2579_p5 = scmp.lt.s32.totalorder %s2577_s29, %s2573_s28 }
   0xe   :  { %p2580_p6 = por %p2579_p5, %p2578_p4 }
  0x10   :  { %p2581_p7 = pnand %p2580_p6, %p2574_p3 }
  0x12   :  { %2584 = shalt.err (!%p2581_p7)
}
  0x13   :  { %50 = dma.hbm_to_vmem [thread:$0]  %s3347_s6, 16, %s48_s18, [#allocation6]  }
  0x14   :  { %s2585_s15 = scalar_lea.hbm %s3343_s2, 256 }
  0x15   :  { %p2586_p8 = scmp.ne.s32.totalorder %s3343_s2, %s2585_s15  ;;  %p2589_p9 = scmp.lt.u32.totalorder %s2585_s15, %s3343_s2 }
  0x17   :  { %p2591_p10 = pnand %p2589_p9, %p2586_p8 }
  0x19   :  { %2594 = shalt.err (!%p2591_p10)
}
  0x1a   :  { %s2595_s22 = scalar_lea.vmem %s2729_s20, 256  ;;  %p2600_p12 = scmp.lt.s32.totalorder %s2729_s20, %s2729_s20 }
  0x1b   :  { %p2596_p11 = scmp.ne.s32.totalorder %s2729_s20, %s2595_s22  ;;  %p2601_p13 = scmp.lt.s32.totalorder %s2595_s22, %s2595_s22 }
  0x1d   :  { %p2602_p0 = por %p2601_p13, %p2600_p12 }
  0x1f   :  { %p2603_p1 = pnand %p2602_p0, %p2596_p11 }
  0x21   :  { %2606 = shalt.err (!%p2603_p1)
}
  0x22   :  { %s2659_s6 = smov 64   ;;  %s2660_s18 = smov 4  }
  0x23   :  { %34 = dma.hbm_to_vmem [thread:$0]  %s3343_s2, 256, %s2729_s20, [#allocation3], %s2659_s6, %s2659_s6, %s2660_s18  }
  0x24   :  { %s2661_s25 = smov [#allocation7]   ;;  %s2607_s29 = scalar_lea.hbm %s3348_s7, 16 }
  0x25   :  { %s57_s26 = sshll.u32 %s2661_s25, 4  ;;  %p2608_p2 = scmp.ne.s32.totalorder %s3348_s7, %s2607_s29  ;;  %s58_s26 = int_to_ptr.vmem [resolvable:$true] %s57_s26 }
  0x26   :  { %p2611_p3 = scmp.lt.u32.totalorder %s2607_s29, %s3348_s7 }
  0x28   :  { %p2613_p4 = pnand %p2611_p3, %p2608_p2 }
  0x2a   :  { %2616 = shalt.err (!%p2613_p4)
}
  0x2b   :  { %s2617_s15 = scalar_lea.vmem %s58_s26, 16  ;;  %s2621_s2 = scalar_lea.vmem %s58_s26, 32 }
  0x2c   :  { %p2618_p5 = scmp.ne.s32.totalorder %s58_s26, %s2617_s15  ;;  %p2622_p6 = scmp.lt.s32.totalorder %s58_s26, %s58_s26 }
  0x2d   :  { %p2623_p7 = scmp.lt.s32.totalorder %s2621_s2, %s2617_s15 }
  0x2f   :  { %p2624_p8 = por %p2623_p7, %p2622_p6 }
  0x31   :  { %p2625_p9 = pnand %p2624_p8, %p2618_p5 }
  0x33   :  { %2628 = shalt.err (!%p2625_p9)
}
  0x34   :  { %60 = dma.hbm_to_vmem [thread:$0]  %s3348_s7, 16, %s58_s26, [#allocation6]  }
  0x35   :  { %2651 = dma.done.wait [#allocation3], 256  }
  0x36   :  { %2652 = vsyncadd [#allocation3], 4294967040 }
  0x37   :  { %2653 = dma.done.wait [#allocation6], 32  }
  0x38   :  { %2654 = vsyncadd [#allocation6], 4294967264  ;;  %v2662_v0 = vmov 0.0   ;;  %vm2663_vm0 = vmmov 0   ;;  %v2780_v1 = vld [vmem:[#allocation2] sm:$0xff]   ;;  %v2786_v3 = vld [vmem:[#allocation2 + $0x8] sm:$0xff]  }
  0x39   :  { %2211 = vmatprep.subr.bf16.mxu1 %v2662_v0  ;;  %2205 = vmatprep.subr.bf16.mxu0 %v2662_v0  ;;  %v2406_v2 = vld [vmem:[%s3342_s1] sm:$0xff]   ;;  %v97_v5 = vld [vmem:[%s3341_s0 + $0x8] sm:$0xff]  ;;  %vm117_vm1 = vcmask 130048   ;;  %v2664_v8 = vmov 0   ;;  %v2848_v52 = vld [vmem:[%s3346_s5 + $0x10] sm:$0xff]   ;;  %vm292_vm2 = vcmask 1041409  }
  0x3a   :  { %2207 = vmatprep.mubr.msk.bf16.mxu0 %vm2663_vm0, %v2662_v0  ;;  %2215 = vmatprep.mubr.msk.bf16.mxu1 %vm2663_vm0, %v2662_v0  ;;  %v96_v4 = vld [vmem:[%s3341_s0] sm:$0xff]  ;;  %v2841_v51 = vld [vmem:[%s3346_s5 + $0x8] sm:$0xff]   ;;  %v2856_v53 = vld [vmem:[%s3346_s5 + $0x18] sm:$0xff]   ;;  %vm174_vm3 = vcmask 261120   ;;  %vm323_vm4 = vcmask 523264   ;;  %vm548_vm5 = vcmask 1042434  }
  0x3b   :  { %2212 = vmatpush3.bf16.msra.mxu1 %v2780_v1  ;;  %2206 = vmatpush3.bf16.msra.mxu0 %v2406_v2  ;;  %v2086_v6 = vld [vmem:[%s3345_s4] ss:$0 sm:$0xff]  ;;  %v2133_v7 = vpack.c.bf16 %v97_v5, %v96_v4  ;;  %s2666_s4 = smov 32   ;;  %vm771_vm6 = vcmask 1043459   ;;  %vm990_vm7 = vcmask 1044484   ;;  %vm1215_vm8 = vcmask 1045509  }
  0x3c   :  { %2213 = vmatprep.subr.bf16.mxu1 %v2662_v0  ;;  %241 = vrot.lane.b32.xlu0 %v2086_v6, %s2659_s6  ;;  %v2078_v20 = vld [vmem:[%s3344_s3] ss:$0 sm:$0xff]  ;;  %s2665_s3 = smov 96   ;;  %vm1434_vm9 = vcmask 1046534   ;;  %vm1659_vm10 = vcmask 1047559   ;;  %vm2060_vm11 = vcmask 58368  }
  0x3d   :  { %2219 = vmatprep.subr.bf16.mxu0 %v2662_v0  ;;  %v2834_v50 = vld [vmem:[%s3346_s5] sm:$0xff]  }
  0x3e   :  { %2208 = vmatmul.mubr.msk.bf16.vlgmr.msra.gmra.mrb[0].mxu0 %vm117_vm1, %v2133_v7  ;;  %v2095_v6 = vld [vmem:[%s3349_s8] ss:$0 sm:$0xff] }
  0x3f   :  { %2214 = vmatpush3.bf16.msra.mxu1 %v2786_v3  ;;  %2227 = vmatprep.mubr.msk.bf16.mxu0 %vm2663_vm0, %v2662_v0 }
  0x40   :  { %2231 = vmatprep.subr.bf16.mxu1 %v2662_v0  ;;  %2220 = vmatpush3.bf16.msra.mxu0 %v2834_v50 }
  0x41   :  { %2221 = vmatprep.subr.bf16.mxu0 %v2662_v0 }
  0x42   :  { %2216 = vmatmul.mubr.bf16.vlgmr.msra.gmra.mrb[0].mxu1 %v2664_v8 }
  0x43   :  { %2232 = vmatpush3.bf16.msra.mxu1 %v2780_v1  ;;  %2235 = vmatprep.mubr.msk.bf16.mxu1 %vm2663_vm0, %v2662_v0 }
  0x44   :  { %2233 = vmatprep.subr.bf16.mxu1 %v2662_v0  ;;  %2222 = vmatpush3.bf16.msra.mxu0 %v2841_v51 }
  0x45   :  { %2223 = vmatprep.subr.bf16.mxu0 %v2662_v0 }
  0x47   :  { %2234 = vmatpush3.bf16.msra.mxu1 %v2786_v3 }
  0x48   :  { %2239 = vmatprep.subr.bf16.mxu1 %v2662_v0  ;;  %2224 = vmatpush3.bf16.msra.mxu0 %v2848_v52 }
  0x49   :  { %2225 = vmatprep.subr.bf16.mxu0 %v2662_v0 }
  0x4c   :  { %2226 = vmatpush3.bf16.msra.mxu0 %v2856_v53 }
  0x4d   :  { %2251 = vmatprep.subr.bf16.mxu0 %v2662_v0 }
  0xae   :  { %v2810_v11 = vpop.permute.xlu0 %241 }
 0x111   :  { %v155_v9 = vpop.f32.mrb[0].mxu0 }
 0x112   :  { %v2209_v10 = vpop.f32.mrb[1].mxu0  ;;  %v2818_v21 = vadd.f32 %v2078_v20, %v155_v9 }
 0x113   :  { %v158_v12 = vpop.f32.mrb[2].mxu0 }
 0x114   :  { %v2210_v14 = vpop.f32.mrb[3].mxu0  ;;  %v2820_v22 = vadd.f32 %v2078_v20, %v158_v12 }
 0x115   :  { %v212_v13 = vpop.f32.mrb[0].mxu1 }
 0x116   :  { %v2217_v15 = vpop.f32.mrb[1].mxu1  ;;  %v244_v16 = vadd.f32 %v2810_v11, %v212_v13  ;;  %v219_v23 = vrot.slane %v212_v13, 1  ;;  %v222_v24 = vadd.f32 %v212_v13, %v2818_v21 }
 0x117   :  { %v215_v17 = vpop.f32.mrb[2].mxu1 }
 0x118   :  { %247 = vrot.lane.b32.xlu1 %v244_v16, %s2659_s6  ;;  %v2218_v18 = vpop.f32.mrb[3].mxu1  ;;  %v246_v19 = vrot.slane %v244_v16, 1  ;;  %v223_v25 = vadd.f32 %v219_v23, %v2820_v22  ;;  %v2084_v26 = vmul.f32 -1.442695, %v222_v24 }
 0x11a   :  { %249 = vrot.lane.b32.xlu0 %v246_v19, %s2659_s6  ;;  %v2085_v27 = vmul.f32 -1.442695, %v223_v25  ;;  %2412 = vpow2.f32 %v2084_v26 }
 0x11c   :  { %2414 = vpow2.f32 %v2085_v27 }
 0x124   :  { %v2413_v28 = vpop.eup %2412 }
 0x125   :  { %v230_v30 = vadd.f32 1.0, %v2413_v28 }
 0x126   :  { %v2415_v29 = vpop.eup %2414 }
 0x127   :  { %v231_v31 = vadd.f32 1.0, %v2415_v29  ;;  %2416 = vrcp.f32 %v230_v30  ;;  %v2906_v29 = vld [vmem:[#allocation5] ss:$0 sm:$0xff] }
 0x129   :  { %2418 = vrcp.f32 %v231_v31 }
 0x131   :  { %v2417_v32 = vpop.eup %2416 }
 0x133   :  { %v2419_v35 = vpop.eup %2418 }
 0x18a   :  { %v248_v33 = vpop.permute.xlu1 %247 }
 0x18b   :  { %v253_v34 = vmul.f32 %v2417_v32, %v248_v33 }
 0x18c   :  { %v250_v36 = vpop.permute.xlu0 %249 }
 0x18d   :  { %257 = vrot.lane.b32.xlu0 %v253_v34, %s2659_s6  ;;  %v254_v37 = vmul.f32 %v2419_v35, %v250_v36 }
 0x18f   :  { %259 = vrot.lane.b32.xlu1 %v254_v37, %s2659_s6 }
 0x1ff   :  { %v258_v38 = vpop.permute.xlu0 %257 }
 0x200   :  { %v263_v39 = vadd.f32 %v258_v38, %v2818_v21 }
 0x201   :  { %v260_v40 = vpop.permute.xlu1 %259 }
 0x202   :  { %2420 = vtanh.f32 %v263_v39  ;;  %v264_v41 = vadd.f32 %v260_v40, %v2820_v22 }
 0x204   :  { %2422 = vtanh.f32 %v264_v41 }
 0x20c   :  { %v2421_v42 = vpop.eup %2420 }
 0x20d   :  { %v267_v43 = vsub.f32 0.0, %v2421_v42 }
 0x20e   :  { %v2423_v44 = vpop.eup %2422 }
 0x20f   :  { %271 = vrot.lane.b32.xlu0 %v267_v43, %s2665_s3  ;;  %v268_v45 = vsub.f32 0.0, %v2423_v44 }
 0x211   :  { %273 = vrot.lane.b32.xlu1 %v268_v45, %s2665_s3 }
 0x281   :  { %v272_v46 = vpop.permute.xlu0 %271 }
 0x282   :  { %v277_v47 = vmul.f32 %v2417_v32, %v272_v46 }
 0x283   :  { %v274_v48 = vpop.permute.xlu1 %273 }
 0x284   :  { %v278_v49 = vmul.f32 %v2419_v35, %v274_v48  ;;  %281 = vrot.lane.b32.xlu0 %v277_v47, %s2666_s4  ;;  %v2094_v48 = vld [vmem:[#allocation7] ss:$0 sm:$0xff] }
 0x286   :  { %283 = vrot.lane.b32.xlu1 %v278_v49, %s2666_s4 }
 0x2f6   :  { %v282_v54 = vpop.permute.xlu0 %281 }
 0x2f7   :  { %v2860_v55 = vadd.f32 %v2421_v42, %v282_v54 }
 0x2f8   :  { %v284_v56 = vpop.permute.xlu1 %283 }
 0x2f9   :  { %v2862_v57 = vadd.f32 %v2423_v44, %v284_v56  ;;  %v420_v58 = vpack.c.bf16 %v2860_v55, %v2860_v55 }
 0x2fb   :  { %v421_v59 = vpack.c.bf16 %v2862_v57, %v2862_v57  ;;  %v291_v60 = vrot.slane %v2862_v57, 7  ;;  %v424_v63 = vunpack.c.l.b16 %v420_v58 }
 0x2fd   :  { %v293_v61 = vsel %vm292_vm2, %v291_v60, %v2860_v55  ;;  %v425_v62 = vunpack.c.l.b16 %v421_v59 }
 0x2fe   :  { %294 = vrot.lane.b32.xlu0 %v293_v61, %s2659_s6 }
 0x2ff   :  { %v426_v2 = vrot.slane %v425_v62, 7 }
 0x301   :  { %v427_v4 = vsel %vm292_vm2, %v426_v2, %v424_v63 }
 0x302   :  { %v428_v5 = vpack.c.b16 %v427_v4, %v427_v4 }
 0x304   :  { %429 = vrot.lane.b32.xlu1 %v428_v5, %s2659_s6 }
 0x308   :  { %394 = vrot.lane.b32.xlu1 %v2095_v6, %s2665_s3 }
 0x370   :  { %v295_v7 = vpop.permute.xlu0 %294 }
 0x371   :  { %v297_v8 = vsel %vm174_vm3, %v295_v7, 0.0 }
 0x372   :  { %v298_v9 = vpack.c.bf16 %v297_v8, %v297_v8 }
 0x374   :  { %2228 = vmatmul.mubr.msk.bf16.vlgmr.msra.gmra.mrb[4].mxu0 %vm323_vm4, %v298_v9 }
 0x375   :  { %2252 = vmatpush3.bf16.msra.mxu0 %v2780_v1  ;;  %2255 = vmatprep.mubr.msk.bf16.mxu0 %vm2663_vm0, %v2662_v0 }
 0x376   :  { %v430_v10 = vpop.permute.xlu1 %429  ;;  %2253 = vmatprep.subr.bf16.mxu0 %v2662_v0 }
 0x377   :  { %2236 = vmatmul.mubr.msk.bf16.vlgmr.msra.gmra.mrb[4].mxu1 %vm174_vm3, %v430_v10 }
 0x378   :  { %2240 = vmatpush3.bf16.msra.mxu1 %v2834_v50  ;;  %2247 = vmatprep.mubr.msk.bf16.mxu1 %vm2663_vm0, %v2662_v0 }
 0x379   :  { %2254 = vmatpush3.bf16.msra.mxu0 %v2786_v3  ;;  %2241 = vmatprep.subr.bf16.mxu1 %v2662_v0 }
 0x37a   :  { %2259 = vmatprep.subr.bf16.mxu0 %v2662_v0  ;;  %v2899_v24 = vpop.permute.xlu1 %394 }
 0x37c   :  { %2242 = vmatpush3.bf16.msra.mxu1 %v2841_v51 }
 0x37d   :  { %2243 = vmatprep.subr.bf16.mxu1 %v2662_v0 }
 0x380   :  { %2244 = vmatpush3.bf16.msra.mxu1 %v2848_v52 }
 0x381   :  { %2245 = vmatprep.subr.bf16.mxu1 %v2662_v0 }
 0x384   :  { %2246 = vmatpush3.bf16.msra.mxu1 %v2856_v53 }
 0x385   :  { %2271 = vmatprep.subr.bf16.mxu1 %v2662_v0 }
 0x447   :  { %v361_v12 = vpop.f32.mrb[4].mxu0 }
 0x448   :  { %v2229_v13 = vpop.f32.mrb[5].mxu0  ;;  %v397_v25 = vadd.f32 %v2899_v24, %v361_v12  ;;  %v373_v31 = vadd.f32 %v2906_v29, %v361_v12 }
 0x449   :  { %v364_v14 = vpop.f32.mrb[6].mxu0 }
 0x44a   :  { %v2230_v15 = vpop.f32.mrb[7].mxu0  ;;  %v468_v16 = vpop.f32.mrb[4].mxu1  ;;  %v2093_v33 = vmul.f32 -1.442695, %v373_v31 }
 0x44b   :  { %v2237_v17 = vpop.f32.mrb[5].mxu1  ;;  %v492_v18 = vadd.f32 %v468_v16, %v2810_v11  ;;  %v475_v26 = vrot.slane %v468_v16, 7  ;;  %v479_v27 = vadd.f32 %v468_v16, %v2820_v22 }
 0x44c   :  { %v471_v19 = vpop.f32.mrb[6].mxu1 }
 0x44d   :  { %497 = vrot.lane.b32.xlu1 %v492_v18, %s2659_s6  ;;  %v2238_v20 = vpop.f32.mrb[7].mxu1  ;;  %v494_v23 = vrot.slane %v492_v18, 7  ;;  %v478_v28 = vadd.f32 %v475_v26, %v2818_v21  ;;  %v2098_v30 = vmul.f32 -1.442695, %v479_v27 }
 0x44f   :  { %495 = vrot.lane.b32.xlu0 %v494_v23, %s2659_s6  ;;  %v2097_v32 = vmul.f32 -1.442695, %v478_v28  ;;  %2424 = vpow2.f32 %v2098_v30 }
 0x451   :  { %2426 = vpow2.f32 %v2097_v32 }
 0x452   :  { %2428 = vpow2.f32 %v2093_v33 }
 0x453   :  { %399 = vrot.lane.b32.xlu0 %v397_v25, %s2666_s4 }
 0x459   :  { %v2425_v34 = vpop.eup %2424 }
 0x45a   :  { %v487_v36 = vadd.f32 1.0, %v2425_v34 }
 0x45b   :  { %v2427_v35 = vpop.eup %2426 }
 0x45c   :  { %v486_v37 = vadd.f32 1.0, %v2427_v35  ;;  %v2429_v38 = vpop.eup %2428  ;;  %2430 = vrcp.f32 %v487_v36 }
 0x45d   :  { %v377_v39 = vadd.f32 1.0, %v2429_v38 }
 0x45e   :  { %2432 = vrcp.f32 %v486_v37 }
 0x45f   :  { %2434 = vrcp.f32 %v377_v39 }
 0x466   :  { %v2431_v40 = vpop.eup %2430 }
 0x468   :  { %v2433_v43 = vpop.eup %2432 }
 0x469   :  { %v2435_v46 = vpop.eup %2434 }
 0x4bf   :  { %v498_v41 = vpop.permute.xlu1 %497 }
 0x4c0   :  { %v502_v42 = vmul.f32 %v2431_v40, %v498_v41 }
 0x4c1   :  { %v496_v44 = vpop.permute.xlu0 %495 }
 0x4c2   :  { %507 = vrot.lane.b32.xlu0 %v502_v42, %s2659_s6  ;;  %v501_v45 = vmul.f32 %v2433_v43, %v496_v44 }
 0x4c4   :  { %505 = vrot.lane.b32.xlu1 %v501_v45, %s2659_s6 }
 0x4c5   :  { %v400_v47 = vpop.permute.xlu0 %399 }
 0x4c6   :  { %v402_v49 = vmul.f32 %v2435_v46, %v400_v47 }
 0x4c8   :  { %385 = vrot.lane.b32.xlu1 %v2094_v48, %s2659_s6  ;;  %404 = vrot.lane.b32.xlu0 %v402_v49, %s2659_s6 }
 0x534   :  { %v508_v54 = vpop.permute.xlu0 %507 }
 0x535   :  { %v512_v56 = vadd.f32 %v508_v54, %v2820_v22 }
 0x536   :  { %v506_v58 = vpop.permute.xlu1 %505 }
 0x537   :  { %2436 = vtanh.f32 %v512_v56  ;;  %v511_v59 = vadd.f32 %v506_v58, %v2818_v21 }
 0x539   :  { %2438 = vtanh.f32 %v511_v59 }
 0x53a   :  { %v2915_v60 = vpop.permute.xlu1 %385  ;;  %v405_v62 = vpop.permute.xlu0 %404 }
 0x53b   :  { %v388_v61 = vadd.f32 %v2915_v60, %v361_v12 }
 0x53d   :  { %v407_v63 = vadd.f32 %v405_v62, %v388_v61 }
 0x53f   :  { %2440 = vtanh.f32 %v407_v63 }
 0x541   :  { %v2437_v2 = vpop.eup %2436 }
 0x542   :  { %v518_v4 = vrot.slane %v2437_v2, 1 }
 0x543   :  { %v2439_v5 = vpop.eup %2438 }
 0x544   :  { %v522_v6 = vsub.f32 %v2862_v57, %v518_v4  ;;  %v517_v7 = vrot.slane %v2439_v5, 1 }
 0x546   :  { %v526_v8 = vrot.slane %v522_v6, 7  ;;  %v521_v9 = vsub.f32 %v2860_v55, %v517_v7 }
 0x548   :  { %529 = vrot.lane.b32.xlu0 %v526_v8, %s2665_s3  ;;  %v525_v10 = vrot.slane %v521_v9, 7 }
 0x549   :  { %v2441_v13 = vpop.eup %2440 }
 0x54a   :  { %527 = vrot.lane.b32.xlu1 %v525_v10, %s2665_s3  ;;  %v409_v14 = vsub.f32 0.0, %v2441_v13 }
 0x54e   :  { %411 = vrot.lane.b32.xlu1 %v409_v14, %s2665_s3 }
 0x5ba   :  { %v530_v12 = vpop.permute.xlu0 %529 }
 0x5bb   :  { %v534_v15 = vmul.f32 %v2431_v40, %v530_v12 }
 0x5bc   :  { %v528_v16 = vpop.permute.xlu1 %527 }
 0x5bd   :  { %v533_v17 = vmul.f32 %v2433_v43, %v528_v16  ;;  %539 = vrot.lane.b32.xlu1 %v534_v15, %s2666_s4 }
 0x5bf   :  { %537 = vrot.lane.b32.xlu0 %v533_v17, %s2666_s4 }
 0x5c0   :  { %v412_v57 = vpop.permute.xlu1 %411 }
 0x5c1   :  { %v414_v18 = vmul.f32 %v2435_v46, %v412_v57 }
 0x5c3   :  { %416 = vrot.lane.b32.xlu0 %v414_v18, %s2666_s4 }
 0x62f   :  { %v540_v55 = vpop.permute.xlu1 %539 }
 0x630   :  { %v2926_v19 = vadd.f32 %v2437_v2, %v540_v55 }
 0x631   :  { %v538_v20 = vpop.permute.xlu0 %537 }
 0x632   :  { %v2928_v23 = vadd.f32 %v2439_v5, %v538_v20  ;;  %v547_v25 = vrot.slane %v2926_v19, 7  ;;  %v642_v26 = vpack.c.bf16 %v2926_v19, %v2926_v19 }
 0x634   :  { %v641_v27 = vpack.c.bf16 %v2928_v23, %v2928_v23  ;;  %v549_v28 = vsel %vm548_vm5, %v547_v25, %v2928_v23  ;;  %v646_v32 = vunpack.c.l.b16 %v642_v26 }
 0x635   :  { %550 = vrot.lane.b32.xlu0 %v549_v28, %s2659_s6  ;;  %v417_v31 = vpop.permute.xlu0 %416 }
 0x636   :  { %v645_v30 = vunpack.c.l.b16 %v641_v27  ;;  %v2938_v35 = vadd.f32 %v2441_v13, %v417_v31 }
 0x638   :  { %v647_v33 = vrot.slane %v645_v30, 1  ;;  %v554_v37 = vrot.slane %v2938_v35, 7 }
 0x63a   :  { %v648_v34 = vsel %vm292_vm2, %v646_v32, %v647_v33 }
 0x63b   :  { %v649_v36 = vpack.c.b16 %v648_v34, %v648_v34 }
 0x63d   :  { %650 = vrot.lane.b32.xlu1 %v649_v36, %s2659_s6 }
 0x641   :  { %555 = vrot.lane.b32.xlu1 %v554_v37, %s2665_s3 }
 0x6a7   :  { %v551_v39 = vpop.permute.xlu0 %550 }
 0x6af   :  { %v651_v38 = vpop.permute.xlu1 %650 }
 0x6b0   :  { %2256 = vmatmul.mubr.msk.bf16.vlgmr.msra.gmra.mrb[8].mxu0 %vm174_vm3, %v651_v38 }
 0x6b1   :  { %2260 = vmatpush3.bf16.msra.mxu0 %v2834_v50  ;;  %2267 = vmatprep.mubr.msk.bf16.mxu0 %vm2663_vm0, %v2662_v0 }
 0x6b2   :  { %2261 = vmatprep.subr.bf16.mxu0 %v2662_v0 }
 0x6b3   :  { %v556_v40 = vpop.permute.xlu1 %555 }
 0x6b4   :  { %v558_v41 = vsel %vm174_vm3, %v551_v39, %v556_v40 }
 0x6b5   :  { %v559_v42 = vpack.c.bf16 %v558_v41, %v558_v41  ;;  %2262 = vmatpush3.bf16.msra.mxu0 %v2841_v51 }
 0x6b6   :  { %2263 = vmatprep.subr.bf16.mxu0 %v2662_v0 }
 0x6b7   :  { %v563_v43 = vshll.u32 %v559_v42, 16  ;;  %v561_v44 = vshrl.u32 %v559_v42, 16 }
 0x6b9   :  { %v565_v45 = vrot.slane %v563_v43, 1  ;;  %2264 = vmatpush3.bf16.msra.mxu0 %v2848_v52 }
 0x6ba   :  { %2265 = vmatprep.subr.bf16.mxu0 %v2662_v0 }
 0x6bb   :  { %v566_v46 = vor.u32 %v565_v45, %v561_v44 }
 0x6bd   :  { %2248 = vmatmul.mubr.msk.bf16.vlgmr.msra.gmra.mrb[8].mxu1 %vm323_vm4, %v566_v46  ;;  %2266 = vmatpush3.bf16.msra.mxu0 %v2856_v53 }
 0x6be   :  { %2272 = vmatpush3.bf16.msra.mxu1 %v2780_v1  ;;  %2275 = vmatprep.mubr.msk.bf16.mxu1 %vm2663_vm0, %v2662_v0 }
 0x6bf   :  { %2273 = vmatprep.subr.bf16.mxu1 %v2662_v0  ;;  %2291 = vmatprep.subr.bf16.mxu0 %v2662_v0 }
 0x6c2   :  { %2274 = vmatpush3.bf16.msra.mxu1 %v2786_v3 }
 0x6c3   :  { %2279 = vmatprep.subr.bf16.mxu1 %v2662_v0 }
 0x783   :  { %v689_v47 = vpop.f32.mrb[8].mxu0 }
 0x784   :  { %v2257_v48 = vpop.f32.mrb[9].mxu0  ;;  %v714_v49 = vadd.f32 %v689_v47, %v2810_v11  ;;  %v696_v5 = vrot.slane %v689_v47, 6  ;;  %v697_v6 = vrot.slane %v689_v47, 7 }
 0x785   :  { %v692_v54 = vpop.f32.mrb[10].mxu0 }
 0x786   :  { %v2258_v56 = vpop.f32.mrb[11].mxu0  ;;  %v717_v58 = vrot.slane %v714_v49, 7  ;;  %v716_v59 = vrot.slane %v714_v49, 6  ;;  %v700_v7 = vadd.f32 %v696_v5, %v2818_v21  ;;  %v701_v8 = vadd.f32 %v697_v6, %v2820_v22 }
 0x788   :  { %720 = vrot.lane.b32.xlu1 %v717_v58, %s2659_s6  ;;  %718 = vrot.lane.b32.xlu0 %v716_v59, %s2659_s6  ;;  %v2102_v9 = vmul.f32 -1.442695, %v700_v7  ;;  %v2103_v10 = vmul.f32 -1.442695, %v701_v8 }
 0x78a   :  { %2442 = vpow2.f32 %v2102_v9 }
 0x78b   :  { %2444 = vpow2.f32 %v2103_v10 }
 0x790   :  { %v604_v61 = vpop.f32.mrb[8].mxu1 }
 0x791   :  { %v618_v62 = vadd.f32 %v604_v61, %v2899_v24  ;;  %v2249_v63 = vpop.f32.mrb[9].mxu1  ;;  %v610_v13 = vadd.f32 %v2906_v29, %v604_v61  ;;  %v617_v38 = vadd.f32 %v604_v61, %v2915_v60 }
 0x792   :  { %v607_v2 = vpop.f32.mrb[10].mxu1 }
 0x793   :  { %v2250_v4 = vpop.f32.mrb[11].mxu1  ;;  %620 = vrot.lane.b32.xlu0 %v618_v62, %s2666_s4  ;;  %v2100_v14 = vmul.f32 -1.442695, %v610_v13 }
 0x794   :  { %v2443_v12 = vpop.eup %2442 }
 0x795   :  { %v2445_v15 = vpop.eup %2444  ;;  %2446 = vpow2.f32 %v2100_v14  ;;  %v708_v16 = vadd.f32 1.0, %v2443_v12 }
 0x796   :  { %v709_v17 = vadd.f32 1.0, %v2445_v15 }
 0x797   :  { %2448 = vrcp.f32 %v708_v16 }
 0x798   :  { %2450 = vrcp.f32 %v709_v17 }
 0x79f   :  { %v2447_v57 = vpop.eup %2446 }
 0x7a0   :  { %v614_v18 = vadd.f32 1.0, %v2447_v57 }
 0x7a1   :  { %v2449_v55 = vpop.eup %2448 }
 0x7a2   :  { %v2451_v20 = vpop.eup %2450  ;;  %2452 = vrcp.f32 %v614_v18 }
 0x7ac   :  { %v2453_v30 = vpop.eup %2452 }
 0x7fa   :  { %v721_v25 = vpop.permute.xlu1 %720  ;;  %v719_v26 = vpop.permute.xlu0 %718 }
 0x7fb   :  { %v725_v27 = vmul.f32 %v2451_v20, %v721_v25  ;;  %v724_v28 = vmul.f32 %v2449_v55, %v719_v26 }
 0x7fd   :  { %730 = vrot.lane.b32.xlu0 %v725_v27, %s2659_s6  ;;  %728 = vrot.lane.b32.xlu1 %v724_v28, %s2659_s6 }
 0x805   :  { %v621_v31 = vpop.permute.xlu0 %620 }
 0x806   :  { %v623_v32 = vmul.f32 %v2453_v30, %v621_v31 }
 0x808   :  { %625 = vrot.lane.b32.xlu1 %v623_v32, %s2659_s6 }
 0x86f   :  { %v731_v33 = vpop.permute.xlu0 %730  ;;  %v729_v34 = vpop.permute.xlu1 %728 }
 0x870   :  { %v735_v36 = vadd.f32 %v731_v33, %v2820_v22  ;;  %v734_v37 = vadd.f32 %v729_v34, %v2818_v21 }
 0x872   :  { %2454 = vtanh.f32 %v735_v36 }
 0x873   :  { %2456 = vtanh.f32 %v734_v37 }
 0x87a   :  { %v626_v39 = vpop.permute.xlu1 %625 }
 0x87b   :  { %v628_v40 = vadd.f32 %v626_v39, %v617_v38 }
 0x87c   :  { %v2455_v41 = vpop.eup %2454 }
 0x87d   :  { %v2457_v42 = vpop.eup %2456  ;;  %2458 = vtanh.f32 %v628_v40  ;;  %v741_v43 = vrot.slane %v2455_v41, 1 }
 0x87e   :  { %v740_v44 = vrot.slane %v2457_v42, 1 }
 0x87f   :  { %v745_v45 = vsub.f32 %v2926_v19, %v741_v43 }
 0x880   :  { %v744_v46 = vsub.f32 %v2928_v23, %v740_v44 }
 0x881   :  { %v749_v47 = vrot.slane %v745_v45, 7 }
 0x882   :  { %v748_v48 = vrot.slane %v744_v46, 7 }
 0x883   :  { %752 = vrot.lane.b32.xlu1 %v749_v47, %s2665_s3 }
 0x884   :  { %750 = vrot.lane.b32.xlu0 %v748_v48, %s2665_s3 }
 0x887   :  { %v2459_v49 = vpop.eup %2458 }
 0x888   :  { %v630_v54 = vsub.f32 %v2938_v35, %v2459_v49 }
 0x88a   :  { %632 = vrot.lane.b32.xlu0 %v630_v54, %s2665_s3 }
 0x8f5   :  { %v753_v56 = vpop.permute.xlu1 %752 }
 0x8f6   :  { %v751_v58 = vpop.permute.xlu0 %750  ;;  %v757_v59 = vmul.f32 %v2451_v20, %v753_v56 }
 0x8f7   :  { %v756_v61 = vmul.f32 %v2449_v55, %v751_v58 }
 0x8f8   :  { %762 = vrot.lane.b32.xlu0 %v757_v59, %s2666_s4 }
 0x8f9   :  { %760 = vrot.lane.b32.xlu1 %v756_v61, %s2666_s4 }
 0x8fc   :  { %v633_v19 = vpop.permute.xlu0 %632 }
 0x8fd   :  { %v635_v23 = vmul.f32 %v2453_v30, %v633_v19 }
 0x8ff   :  { %637 = vrot.lane.b32.xlu1 %v635_v23, %s2666_s4 }
 0x96a   :  { %v763_v62 = vpop.permute.xlu0 %762 }
 0x96b   :  { %v2985_v63 = vadd.f32 %v2455_v41, %v763_v62  ;;  %v761_v2 = vpop.permute.xlu1 %760 }
 0x96c   :  { %v2987_v4 = vadd.f32 %v2457_v42, %v761_v2 }
 0x96d   :  { %v860_v35 = vpack.c.bf16 %v2985_v63, %v2985_v63  ;;  %v770_v5 = vrot.slane %v2985_v63, 7 }
 0x96e   :  { %v859_v6 = vpack.c.bf16 %v2987_v4, %v2987_v4 }
 0x96f   :  { %v864_v7 = vunpack.c.l.b16 %v860_v35  ;;  %v772_v8 = vsel %vm771_vm6, %v770_v5, %v2987_v4 }
 0x970   :  { %v863_v9 = vunpack.c.l.b16 %v859_v6  ;;  %773 = vrot.lane.b32.xlu1 %v772_v8, %s2659_s6 }
 0x971   :  { %v866_v10 = vrot.slane %v864_v7, 1  ;;  %v638_v14 = vpop.permute.xlu1 %637 }
 0x972   :  { %v865_v13 = vrot.slane %v863_v9, 2  ;;  %v2997_v15 = vadd.f32 %v2459_v49, %v638_v14 }
 0x974   :  { %v867_v12 = vsel %vm292_vm2, %v866_v10, %v865_v13  ;;  %v777_v17 = vrot.slane %v2997_v15, 6 }
 0x975   :  { %v868_v16 = vpack.c.b16 %v867_v12, %v867_v12 }
 0x977   :  { %869 = vrot.lane.b32.xlu0 %v868_v16, %s2659_s6 }
 0x97b   :  { %778 = vrot.lane.b32.xlu0 %v777_v17, %s2665_s3 }
 0x9e2   :  { %v774_v18 = vpop.permute.xlu1 %773 }
 0x9e9   :  { %v870_v57 = vpop.permute.xlu0 %869 }
 0x9ea   :  { %2276 = vmatmul.mubr.msk.bf16.vlgmr.msra.gmra.mrb[12].mxu1 %vm174_vm3, %v870_v57 }
 0x9eb   :  { %2280 = vmatpush3.bf16.msra.mxu1 %v2834_v50  ;;  %2287 = vmatprep.mubr.msk.bf16.mxu1 %vm2663_vm0, %v2662_v0 }
 0x9ec   :  { %2281 = vmatprep.subr.bf16.mxu1 %v2662_v0 }
 0x9ed   :  { %v779_v55 = vpop.permute.xlu0 %778 }
 0x9ee   :  { %v781_v20 = vsel %vm174_vm3, %v774_v18, %v779_v55 }
 0x9ef   :  { %v782_v25 = vpack.c.bf16 %v781_v20, %v781_v20  ;;  %2282 = vmatpush3.bf16.msra.mxu1 %v2841_v51 }
 0x9f0   :  { %2283 = vmatprep.subr.bf16.mxu1 %v2662_v0 }
 0x9f1   :  { %v784_v26 = vrot.slane %v782_v25, 1 }
 0x9f3   :  { %2268 = vmatmul.mubr.msk.bf16.vlgmr.msra.gmra.mrb[12].mxu0 %vm323_vm4, %v784_v26  ;;  %2284 = vmatpush3.bf16.msra.mxu1 %v2848_v52 }
 0x9f4   :  { %2292 = vmatpush3.bf16.msra.mxu0 %v2780_v1  ;;  %2295 = vmatprep.mubr.msk.bf16.mxu0 %vm2663_vm0, %v2662_v0 }
 0x9f5   :  { %2293 = vmatprep.subr.bf16.mxu0 %v2662_v0  ;;  %2285 = vmatprep.subr.bf16.mxu1 %v2662_v0 }
 0x9f7   :  { %2286 = vmatpush3.bf16.msra.mxu1 %v2856_v53 }
 0x9f8   :  { %2294 = vmatpush3.bf16.msra.mxu0 %v2786_v3  ;;  %2311 = vmatprep.subr.bf16.mxu1 %v2662_v0 }
 0x9f9   :  { %2299 = vmatprep.subr.bf16.mxu0 %v2662_v0 }
 0xabd   :  { %v908_v27 = vpop.f32.mrb[12].mxu1 }
 0xabe   :  { %v2277_v28 = vpop.f32.mrb[13].mxu1  ;;  %v933_v30 = vadd.f32 %v908_v27, %v2810_v11  ;;  %v915_v40 = vrot.slane %v908_v27, 5  ;;  %v916_v41 = vrot.slane %v908_v27, 6 }
 0xabf   :  { %v911_v1 = vpop.f32.mrb[14].mxu1 }
 0xac0   :  { %v2278_v31 = vpop.f32.mrb[15].mxu1  ;;  %v935_v32 = vrot.slane %v933_v30, 5  ;;  %v936_v33 = vrot.slane %v933_v30, 6  ;;  %v919_v42 = vadd.f32 %v915_v40, %v2818_v21  ;;  %v920_v43 = vadd.f32 %v916_v41, %v2820_v22 }
 0xac2   :  { %937 = vrot.lane.b32.xlu1 %v935_v32, %s2659_s6  ;;  %939 = vrot.lane.b32.xlu0 %v936_v33, %s2659_s6  ;;  %v2107_v44 = vmul.f32 -1.442695, %v919_v42  ;;  %v2108_v45 = vmul.f32 -1.442695, %v920_v43 }
 0xac4   :  { %2460 = vpow2.f32 %v2107_v44 }
 0xac5   :  { %2462 = vpow2.f32 %v2108_v45 }
 0xac6   :  { %v822_v34 = vpop.f32.mrb[12].mxu0 }
 0xac7   :  { %v836_v36 = vadd.f32 %v822_v34, %v2899_v24  ;;  %v2269_v37 = vpop.f32.mrb[13].mxu0  ;;  %v828_v46 = vadd.f32 %v2906_v29, %v822_v34  ;;  %v835_v14 = vadd.f32 %v822_v34, %v2915_v60 }
 0xac8   :  { %v825_v38 = vpop.f32.mrb[14].mxu0 }
 0xac9   :  { %838 = vrot.lane.b32.xlu1 %v836_v36, %s2666_s4  ;;  %v2270_v39 = vpop.f32.mrb[15].mxu0  ;;  %v2105_v47 = vmul.f32 -1.442695, %v828_v46 }
 0xacb   :  { %2464 = vpow2.f32 %v2105_v47 }
 0xace   :  { %v2461_v48 = vpop.eup %2460 }
 0xacf   :  { %v2463_v49 = vpop.eup %2462  ;;  %v927_v54 = vadd.f32 1.0, %v2461_v48 }
 0xad0   :  { %v928_v56 = vadd.f32 1.0, %v2463_v49 }
 0xad1   :  { %2466 = vrcp.f32 %v927_v54 }
 0xad2   :  { %2468 = vrcp.f32 %v928_v56 }
 0xad5   :  { %v2465_v58 = vpop.eup %2464 }
 0xad6   :  { %v832_v59 = vadd.f32 1.0, %v2465_v58 }
 0xad8   :  { %2470 = vrcp.f32 %v832_v59 }
 0xadb   :  { %v2467_v61 = vpop.eup %2466 }
 0xadc   :  { %v2469_v19 = vpop.eup %2468 }
 0xae2   :  { %v2471_v5 = vpop.eup %2470 }
 0xb34   :  { %v940_v23 = vpop.permute.xlu0 %939  ;;  %v938_v62 = vpop.permute.xlu1 %937 }
 0xb35   :  { %v944_v2 = vmul.f32 %v2469_v19, %v940_v23  ;;  %v943_v35 = vmul.f32 %v2467_v61, %v938_v62 }
 0xb37   :  { %947 = vrot.lane.b32.xlu0 %v943_v35, %s2659_s6  ;;  %949 = vrot.lane.b32.xlu1 %v944_v2, %s2659_s6 }
 0xb3b   :  { %v839_v6 = vpop.permute.xlu1 %838 }
 0xb3c   :  { %v841_v7 = vmul.f32 %v2471_v5, %v839_v6 }
 0xb3e   :  { %843 = vrot.lane.b32.xlu0 %v841_v7, %s2659_s6 }
 0xba9   :  { %v948_v8 = vpop.permute.xlu0 %947  ;;  %v950_v9 = vpop.permute.xlu1 %949 }
 0xbaa   :  { %v953_v10 = vadd.f32 %v948_v8, %v2818_v21  ;;  %v954_v13 = vadd.f32 %v950_v9, %v2820_v22 }
 0xbac   :  { %2472 = vtanh.f32 %v953_v10 }
 0xbad   :  { %2474 = vtanh.f32 %v954_v13 }
 0xbb0   :  { %v844_v12 = vpop.permute.xlu0 %843 }
 0xbb1   :  { %v846_v16 = vadd.f32 %v844_v12, %v835_v14 }
 0xbb3   :  { %2476 = vtanh.f32 %v846_v16 }
 0xbb6   :  { %v2473_v17 = vpop.eup %2472 }
 0xbb7   :  { %v2475_v57 = vpop.eup %2474  ;;  %v959_v18 = vrot.slane %v2473_v17, 1 }
 0xbb8   :  { %v960_v55 = vrot.slane %v2475_v57, 1 }
 0xbb9   :  { %v963_v20 = vsub.f32 %v2987_v4, %v959_v18 }
 0xbba   :  { %v964_v25 = vsub.f32 %v2985_v63, %v960_v55 }
 0xbbb   :  { %v967_v26 = vrot.slane %v963_v20, 7 }
 0xbbc   :  { %v968_v27 = vrot.slane %v964_v25, 7 }
 0xbbd   :  { %v2477_v28 = vpop.eup %2476  ;;  %969 = vrot.lane.b32.xlu1 %v967_v26, %s2665_s3 }
 0xbbe   :  { %971 = vrot.lane.b32.xlu0 %v968_v27, %s2665_s3  ;;  %v848_v30 = vsub.f32 %v2997_v15, %v2477_v28 }
 0xbc1   :  { %850 = vrot.lane.b32.xlu1 %v848_v30, %s2665_s3 }
 0xc2f   :  { %v970_v1 = vpop.permute.xlu1 %969 }
 0xc30   :  { %v975_v31 = vmul.f32 %v2467_v61, %v970_v1  ;;  %v972_v32 = vpop.permute.xlu0 %971 }
 0xc31   :  { %v976_v33 = vmul.f32 %v2469_v19, %v972_v32 }
 0xc32   :  { %979 = vrot.lane.b32.xlu0 %v975_v31, %s2666_s4 }
 0xc33   :  { %981 = vrot.lane.b32.xlu1 %v976_v33, %s2666_s4  ;;  %v851_v63 = vpop.permute.xlu1 %850 }
 0xc34   :  { %v853_v4 = vmul.f32 %v2471_v5, %v851_v63  ;;  %v3073_v5 = vld [vmem:[#allocation2] sm:$0xff]  }
 0xc36   :  { %855 = vrot.lane.b32.xlu0 %v853_v4, %s2666_s4 }
 0xca4   :  { %v980_v34 = vpop.permute.xlu0 %979 }
 0xca5   :  { %v982_v36 = vpop.permute.xlu1 %981  ;;  %v3044_v37 = vadd.f32 %v2473_v17, %v980_v34 }
 0xca6   :  { %v3046_v38 = vadd.f32 %v2475_v57, %v982_v36 }
 0xca7   :  { %v1084_v15 = vpack.c.bf16 %v3044_v37, %v3044_v37 }
 0xca8   :  { %v1085_v39 = vpack.c.bf16 %v3046_v38, %v3046_v38  ;;  %v989_v40 = vrot.slane %v3046_v38, 7  ;;  %v856_v46 = vpop.permute.xlu0 %855 }
 0xca9   :  { %v1088_v41 = vunpack.c.l.b16 %v1084_v15  ;;  %v3056_v48 = vadd.f32 %v2477_v28, %v856_v46 }
 0xcaa   :  { %v1089_v42 = vunpack.c.l.b16 %v1085_v39  ;;  %v991_v43 = vsel %vm990_vm7, %v989_v40, %v3044_v37 }
 0xcab   :  { %v1090_v44 = vrot.slane %v1088_v41, 3  ;;  %992 = vrot.lane.b32.xlu0 %v991_v43, %s2659_s6  ;;  %v996_v54 = vrot.slane %v3056_v48, 5 }
 0xcac   :  { %v1091_v45 = vrot.slane %v1089_v42, 2 }
 0xcae   :  { %v1092_v47 = vsel %vm292_vm2, %v1091_v45, %v1090_v44 }
 0xcaf   :  { %v1093_v49 = vpack.c.b16 %v1092_v47, %v1092_v47 }
 0xcb1   :  { %1094 = vrot.lane.b32.xlu1 %v1093_v49, %s2659_s6 }
 0xcb5   :  { %997 = vrot.lane.b32.xlu1 %v996_v54, %s2665_s3 }
 0xd1d   :  { %v993_v58 = vpop.permute.xlu0 %992 }
 0xd23   :  { %v1095_v56 = vpop.permute.xlu1 %1094 }
 0xd24   :  { %2296 = vmatmul.mubr.msk.bf16.vlgmr.msra.gmra.mrb[16].mxu0 %vm174_vm3, %v1095_v56 }
 0xd25   :  { %2300 = vmatpush3.bf16.msra.mxu0 %v2834_v50  ;;  %2307 = vmatprep.mubr.msk.bf16.mxu0 %vm2663_vm0, %v2662_v0 }
 0xd26   :  { %2301 = vmatprep.subr.bf16.mxu0 %v2662_v0 }
 0xd27   :  { %v998_v59 = vpop.permute.xlu1 %997 }
 0xd28   :  { %v1000_v61 = vsel %vm174_vm3, %v993_v58, %v998_v59 }
 0xd29   :  { %v1001_v19 = vpack.c.bf16 %v1000_v61, %v1000_v61  ;;  %2302 = vmatpush3.bf16.msra.mxu0 %v2841_v51 }
 0xd2a   :  { %2303 = vmatprep.subr.bf16.mxu0 %v2662_v0 }
 0xd2b   :  { %v1003_v23 = vshrl.u32 %v1001_v19, 16  ;;  %v1006_v62 = vshll.u32 %v1001_v19, 16 }
 0xd2d   :  { %v1005_v2 = vrot.slane %v1003_v23, 1  ;;  %v1008_v35 = vrot.slane %v1006_v62, 2  ;;  %2304 = vmatpush3.bf16.msra.mxu0 %v2848_v52 }
 0xd2e   :  { %2305 = vmatprep.subr.bf16.mxu0 %v2662_v0 }
 0xd2f   :  { %v1009_v50 = vor.u32 %v1008_v35, %v1005_v2 }
 0xd31   :  { %2288 = vmatmul.mubr.msk.bf16.vlgmr.msra.gmra.mrb[16].mxu1 %vm323_vm4, %v1009_v50  ;;  %2306 = vmatpush3.bf16.msra.mxu0 %v2856_v53 }
 0xd32   :  { %2312 = vmatpush3.bf16.msra.mxu1 %v3073_v5  ;;  %2315 = vmatprep.mubr.msk.bf16.mxu1 %vm2663_vm0, %v2662_v0 }
 0xd33   :  { %2313 = vmatprep.subr.bf16.mxu1 %v2662_v0  ;;  %2331 = vmatprep.subr.bf16.mxu0 %v2662_v0 }
 0xd36   :  { %2314 = vmatpush3.bf16.msra.mxu1 %v2786_v3 }
 0xd37   :  { %2319 = vmatprep.subr.bf16.mxu1 %v2662_v0 }
 0xdf7   :  { %v1133_v51 = vpop.f32.mrb[16].mxu0 }
 0xdf8   :  { %v2297_v52 = vpop.f32.mrb[17].mxu0  ;;  %v1158_v6 = vadd.f32 %v1133_v51, %v2810_v11  ;;  %v1140_v16 = vrot.slane %v1133_v51, 4  ;;  %v1141_v17 = vrot.slane %v1133_v51, 5 }
 0xdf9   :  { %v1136_v53 = vpop.f32.mrb[18].mxu0 }
 0xdfa   :  { %v2298_v7 = vpop.f32.mrb[19].mxu0  ;;  %v1161_v8 = vrot.slane %v1158_v6, 5  ;;  %v1160_v9 = vrot.slane %v1158_v6, 4  ;;  %v1144_v57 = vadd.f32 %v1140_v16, %v2818_v21  ;;  %v1145_v18 = vadd.f32 %v1141_v17, %v2820_v22 }
 0xdfc   :  { %1164 = vrot.lane.b32.xlu1 %v1161_v8, %s2659_s6  ;;  %1162 = vrot.lane.b32.xlu0 %v1160_v9, %s2659_s6  ;;  %v2112_v55 = vmul.f32 -1.442695, %v1144_v57  ;;  %v2113_v20 = vmul.f32 -1.442695, %v1145_v18 }
 0xdfe   :  { %2478 = vpow2.f32 %v2112_v55 }
 0xdff   :  { %2480 = vpow2.f32 %v2113_v20 }
 0xe04   :  { %v1047_v10 = vpop.f32.mrb[16].mxu1 }
 0xe05   :  { %v1061_v13 = vadd.f32 %v1047_v10, %v2899_v24  ;;  %v2289_v14 = vpop.f32.mrb[17].mxu1  ;;  %v1053_v25 = vadd.f32 %v2906_v29, %v1047_v10  ;;  %v1060_v46 = vadd.f32 %v1047_v10, %v2915_v60 }
 0xe06   :  { %v1050_v12 = vpop.f32.mrb[18].mxu1 }
 0xe07   :  { %v2290_v3 = vpop.f32.mrb[19].mxu1  ;;  %1063 = vrot.lane.b32.xlu0 %v1061_v13, %s2666_s4  ;;  %v2110_v26 = vmul.f32 -1.442695, %v1053_v25 }
 0xe08   :  { %v2479_v27 = vpop.eup %2478 }
 0xe09   :  { %v2481_v28 = vpop.eup %2480  ;;  %2482 = vpow2.f32 %v2110_v26  ;;  %v1152_v30 = vadd.f32 1.0, %v2479_v27  ;;  %v3126_v27 = vld [vmem:[%s3346_s5] sm:$0xff]  }
 0xe0a   :  { %v1153_v1 = vadd.f32 1.0, %v2481_v28 }
 0xe0b   :  { %2484 = vrcp.f32 %v1152_v30 }
 0xe0c   :  { %2486 = vrcp.f32 %v1153_v1 }
 0xe13   :  { %v2483_v31 = vpop.eup %2482 }
 0xe14   :  { %v1057_v32 = vadd.f32 1.0, %v2483_v31 }
 0xe15   :  { %v2485_v33 = vpop.eup %2484 }
 0xe16   :  { %v2487_v63 = vpop.eup %2486  ;;  %2488 = vrcp.f32 %v1057_v32  ;;  %v3136_v32 = vld [vmem:[%s3346_s5 + $0x8] sm:$0xff]  }
 0xe20   :  { %v2489_v39 = vpop.eup %2488 }
 0xe6e   :  { %v1165_v4 = vpop.permute.xlu1 %1164  ;;  %v1163_v34 = vpop.permute.xlu0 %1162 }
 0xe6f   :  { %v1169_v36 = vmul.f32 %v2487_v63, %v1165_v4  ;;  %v1168_v15 = vmul.f32 %v2485_v33, %v1163_v34  ;;  %v3155_v4 = vld [vmem:[%s3346_s5 + $0x18] sm:$0xff]   ;;  %v3158_v34 = vld [vmem:[#allocation2 + $0x8] sm:$0xff]  }
 0xe71   :  { %1174 = vrot.lane.b32.xlu0 %v1169_v36, %s2659_s6  ;;  %1172 = vrot.lane.b32.xlu1 %v1168_v15, %s2659_s6 }
 0xe79   :  { %v1064_v40 = vpop.permute.xlu0 %1063 }
 0xe7a   :  { %v1066_v41 = vmul.f32 %v2489_v39, %v1064_v40 }
 0xe7c   :  { %1068 = vrot.lane.b32.xlu1 %v1066_v41, %s2659_s6 }
 0xee3   :  { %v1175_v42 = vpop.permute.xlu0 %1174  ;;  %v1173_v43 = vpop.permute.xlu1 %1172 }
 0xee4   :  { %v1179_v44 = vadd.f32 %v1175_v42, %v2820_v22  ;;  %v1178_v45 = vadd.f32 %v1173_v43, %v2818_v21 }
 0xee6   :  { %2490 = vtanh.f32 %v1179_v44 }
 0xee7   :  { %2492 = vtanh.f32 %v1178_v45 }
 0xeee   :  { %v1069_v47 = vpop.permute.xlu1 %1068 }
 0xeef   :  { %v1071_v49 = vadd.f32 %v1069_v47, %v1060_v46 }
 0xef0   :  { %v2491_v54 = vpop.eup %2490 }
 0xef1   :  { %v2493_v56 = vpop.eup %2492  ;;  %2494 = vtanh.f32 %v1071_v49  ;;  %v1185_v58 = vrot.slane %v2491_v54, 1 }
 0xef2   :  { %v1184_v59 = vrot.slane %v2493_v56, 1 }
 0xef3   :  { %v1189_v61 = vsub.f32 %v3046_v38, %v1185_v58 }
 0xef4   :  { %v1188_v19 = vsub.f32 %v3044_v37, %v1184_v59 }
 0xef5   :  { %v1193_v23 = vrot.slane %v1189_v61, 7 }
 0xef6   :  { %v1192_v62 = vrot.slane %v1188_v19, 7 }
 0xef7   :  { %1196 = vrot.lane.b32.xlu1 %v1193_v23, %s2665_s3 }
 0xef8   :  { %1194 = vrot.lane.b32.xlu0 %v1192_v62, %s2665_s3 }
 0xefb   :  { %v2495_v2 = vpop.eup %2494 }
 0xefc   :  { %v1073_v35 = vsub.f32 %v3056_v48, %v2495_v2 }
 0xefe   :  { %1075 = vrot.lane.b32.xlu0 %v1073_v35, %s2665_s3 }
 0xf69   :  { %v1197_v50 = vpop.permute.xlu1 %1196 }
 0xf6a   :  { %v1195_v51 = vpop.permute.xlu0 %1194  ;;  %v1201_v52 = vmul.f32 %v2487_v63, %v1197_v50  ;;  %v3144_v63 = vld [vmem:[%s3346_s5 + $0x10] sm:$0xff]  }
 0xf6b   :  { %v1200_v6 = vmul.f32 %v2485_v33, %v1195_v51 }
 0xf6c   :  { %1206 = vrot.lane.b32.xlu0 %v1201_v52, %s2666_s4 }
 0xf6d   :  { %1204 = vrot.lane.b32.xlu1 %v1200_v6, %s2666_s4 }
 0xf70   :  { %v1076_v37 = vpop.permute.xlu0 %1075 }
 0xf71   :  { %v1078_v38 = vmul.f32 %v2489_v39, %v1076_v37 }
 0xf73   :  { %1080 = vrot.lane.b32.xlu1 %v1078_v38, %s2666_s4 }
 0xfde   :  { %v1207_v53 = vpop.permute.xlu0 %1206 }
 0xfdf   :  { %v3105_v7 = vadd.f32 %v2491_v54, %v1207_v53  ;;  %v1205_v8 = vpop.permute.xlu1 %1204 }
 0xfe0   :  { %v3107_v9 = vadd.f32 %v2493_v56, %v1205_v8 }
 0xfe1   :  { %v1304_v48 = vpack.c.bf16 %v3105_v7, %v3105_v7  ;;  %v1214_v10 = vrot.slane %v3105_v7, 7 }
 0xfe2   :  { %v1303_v13 = vpack.c.bf16 %v3107_v9, %v3107_v9 }
 0xfe3   :  { %v1308_v14 = vunpack.c.l.b16 %v1304_v48  ;;  %v1216_v12 = vsel %vm1215_vm8, %v1214_v10, %v3107_v9 }
 0xfe4   :  { %v1307_v3 = vunpack.c.l.b16 %v1303_v13  ;;  %1217 = vrot.lane.b32.xlu1 %v1216_v12, %s2659_s6 }
 0xfe5   :  { %v1310_v16 = vrot.slane %v1308_v14, 3  ;;  %v1081_v57 = vpop.permute.xlu1 %1080 }
 0xfe6   :  { %v1309_v17 = vrot.slane %v1307_v3, 4  ;;  %v3117_v55 = vadd.f32 %v2495_v2, %v1081_v57 }
 0xfe8   :  { %v1311_v18 = vsel %vm292_vm2, %v1310_v16, %v1309_v17  ;;  %v1221_v25 = vrot.slane %v3117_v55, 4 }
 0xfe9   :  { %v1312_v20 = vpack.c.b16 %v1311_v18, %v1311_v18 }
 0xfeb   :  { %1313 = vrot.lane.b32.xlu0 %v1312_v20, %s2659_s6 }
 0xfef   :  { %1222 = vrot.lane.b32.xlu0 %v1221_v25, %s2665_s3 }
0x1056   :  { %v1218_v28 = vpop.permute.xlu1 %1217 }
0x105d   :  { %v1314_v26 = vpop.permute.xlu0 %1313 }
0x105e   :  { %2316 = vmatmul.mubr.msk.bf16.vlgmr.msra.gmra.mrb[20].mxu1 %vm174_vm3, %v1314_v26 }
0x105f   :  { %2320 = vmatpush3.bf16.msra.mxu1 %v3126_v27  ;;  %2327 = vmatprep.mubr.msk.bf16.mxu1 %vm2663_vm0, %v2662_v0 }
0x1060   :  { %2321 = vmatprep.subr.bf16.mxu1 %v2662_v0 }
0x1061   :  { %v1223_v30 = vpop.permute.xlu0 %1222 }
0x1062   :  { %v1225_v1 = vsel %vm174_vm3, %v1218_v28, %v1223_v30 }
0x1063   :  { %v1226_v31 = vpack.c.bf16 %v1225_v1, %v1225_v1  ;;  %2322 = vmatpush3.bf16.msra.mxu1 %v3136_v32 }
0x1064   :  { %2323 = vmatprep.subr.bf16.mxu1 %v2662_v0 }
0x1065   :  { %v1228_v33 = vrot.slane %v1226_v31, 2 }
0x1067   :  { %2308 = vmatmul.mubr.msk.bf16.vlgmr.msra.gmra.mrb[20].mxu0 %vm323_vm4, %v1228_v33  ;;  %2324 = vmatpush3.bf16.msra.mxu1 %v3144_v63 }
0x1068   :  { %2332 = vmatpush3.bf16.msra.mxu0 %v3073_v5  ;;  %2335 = vmatprep.mubr.msk.bf16.mxu0 %vm2663_vm0, %v2662_v0 }
0x1069   :  { %2333 = vmatprep.subr.bf16.mxu0 %v2662_v0  ;;  %2325 = vmatprep.subr.bf16.mxu1 %v2662_v0 }
0x106b   :  { %2326 = vmatpush3.bf16.msra.mxu1 %v3155_v4 }
0x106c   :  { %2334 = vmatpush3.bf16.msra.mxu0 %v3158_v34  ;;  %2351 = vmatprep.subr.bf16.mxu1 %v2662_v0 }
0x106d   :  { %2339 = vmatprep.subr.bf16.mxu0 %v2662_v0 }
0x1131   :  { %v1352_v36 = vpop.f32.mrb[20].mxu1 }
0x1132   :  { %v2317_v15 = vpop.f32.mrb[21].mxu1  ;;  %v1377_v39 = vadd.f32 %v1352_v36, %v2810_v11  ;;  %v1359_v54 = vrot.slane %v1352_v36, 3  ;;  %v1360_v56 = vrot.slane %v1352_v36, 4 }
0x1133   :  { %v1355_v40 = vpop.f32.mrb[22].mxu1 }
0x1134   :  { %v2318_v41 = vpop.f32.mrb[23].mxu1  ;;  %v1379_v42 = vrot.slane %v1377_v39, 3  ;;  %v1380_v43 = vrot.slane %v1377_v39, 4  ;;  %v1363_v58 = vadd.f32 %v1359_v54, %v2818_v21  ;;  %v1364_v59 = vadd.f32 %v1360_v56, %v2820_v22 }
0x1136   :  { %1381 = vrot.lane.b32.xlu1 %v1379_v42, %s2659_s6  ;;  %1383 = vrot.lane.b32.xlu0 %v1380_v43, %s2659_s6  ;;  %v2117_v61 = vmul.f32 -1.442695, %v1363_v58  ;;  %v2118_v19 = vmul.f32 -1.442695, %v1364_v59 }
0x1138   :  { %2496 = vpow2.f32 %v2117_v61 }
0x1139   :  { %2498 = vpow2.f32 %v2118_v19 }
0x113a   :  { %v1266_v44 = vpop.f32.mrb[20].mxu0 }
0x113b   :  { %v1280_v45 = vadd.f32 %v1266_v44, %v2899_v24  ;;  %v2309_v46 = vpop.f32.mrb[21].mxu0  ;;  %v1272_v23 = vadd.f32 %v2906_v29, %v1266_v44  ;;  %v1279_v57 = vadd.f32 %v1266_v44, %v2915_v60 }
0x113c   :  { %v1269_v47 = vpop.f32.mrb[22].mxu0 }
0x113d   :  { %1282 = vrot.lane.b32.xlu1 %v1280_v45, %s2666_s4  ;;  %v2310_v49 = vpop.f32.mrb[23].mxu0  ;;  %v2115_v62 = vmul.f32 -1.442695, %v1272_v23 }
0x113f   :  { %2500 = vpow2.f32 %v2115_v62 }
0x1142   :  { %v2497_v2 = vpop.eup %2496 }
0x1143   :  { %v2499_v35 = vpop.eup %2498  ;;  %v1371_v50 = vadd.f32 1.0, %v2497_v2 }
0x1144   :  { %v1372_v51 = vadd.f32 1.0, %v2499_v35 }
0x1145   :  { %2502 = vrcp.f32 %v1371_v50 }
0x1146   :  { %2504 = vrcp.f32 %v1372_v51 }
0x1149   :  { %v2501_v52 = vpop.eup %2500 }
0x114a   :  { %v1276_v6 = vadd.f32 1.0, %v2501_v52 }
0x114c   :  { %2506 = vrcp.f32 %v1276_v6 }
0x114f   :  { %v2503_v37 = vpop.eup %2502 }
0x1150   :  { %v2505_v38 = vpop.eup %2504 }
0x1156   :  { %v2507_v29 = vpop.eup %2506 }
0x11a8   :  { %v1384_v53 = vpop.permute.xlu0 %1383  ;;  %v1382_v8 = vpop.permute.xlu1 %1381 }
0x11a9   :  { %v1388_v48 = vmul.f32 %v2505_v38, %v1384_v53  ;;  %v1387_v10 = vmul.f32 %v2503_v37, %v1382_v8 }
0x11ab   :  { %1391 = vrot.lane.b32.xlu0 %v1387_v10, %s2659_s6  ;;  %1393 = vrot.lane.b32.xlu1 %v1388_v48, %s2659_s6 }
0x11af   :  { %v1283_v13 = vpop.permute.xlu1 %1282 }
0x11b0   :  { %v1285_v14 = vmul.f32 %v2507_v29, %v1283_v13 }
0x11b2   :  { %1287 = vrot.lane.b32.xlu0 %v1285_v14, %s2659_s6 }
0x121d   :  { %v1392_v12 = vpop.permute.xlu0 %1391  ;;  %v1394_v3 = vpop.permute.xlu1 %1393 }
0x121e   :  { %v1397_v16 = vadd.f32 %v1392_v12, %v2818_v21  ;;  %v1398_v17 = vadd.f32 %v1394_v3, %v2820_v22 }
0x1220   :  { %2508 = vtanh.f32 %v1397_v16 }
0x1221   :  { %2510 = vtanh.f32 %v1398_v17 }
0x1224   :  { %v1288_v18 = vpop.permute.xlu0 %1287 }
0x1225   :  { %v1290_v20 = vadd.f32 %v1288_v18, %v1279_v57 }
0x1227   :  { %2512 = vtanh.f32 %v1290_v20 }
0x122a   :  { %v2509_v25 = vpop.eup %2508 }
0x122b   :  { %v2511_v26 = vpop.eup %2510  ;;  %v1403_v28 = vrot.slane %v2509_v25, 1 }
0x122c   :  { %v1404_v30 = vrot.slane %v2511_v26, 1 }
0x122d   :  { %v1407_v1 = vsub.f32 %v3107_v9, %v1403_v28 }
0x122e   :  { %v1408_v31 = vsub.f32 %v3105_v7, %v1404_v30 }
0x122f   :  { %v1411_v33 = vrot.slane %v1407_v1, 7 }
0x1230   :  { %v1412_v36 = vrot.slane %v1408_v31, 7 }
0x1231   :  { %v2513_v15 = vpop.eup %2512  ;;  %1413 = vrot.lane.b32.xlu1 %v1411_v33, %s2665_s3 }
0x1232   :  { %1415 = vrot.lane.b32.xlu0 %v1412_v36, %s2665_s3  ;;  %v1292_v39 = vsub.f32 %v3117_v55, %v2513_v15  ;;  %v3228_v36 = vld [vmem:[#allocation5] ss:$0 sm:$0xff] }
0x1235   :  { %1294 = vrot.lane.b32.xlu1 %v1292_v39, %s2665_s3 }
0x12a3   :  { %v1414_v40 = vpop.permute.xlu1 %1413 }
0x12a4   :  { %v1419_v41 = vmul.f32 %v2503_v37, %v1414_v40  ;;  %v1416_v42 = vpop.permute.xlu0 %1415 }
0x12a5   :  { %v1420_v43 = vmul.f32 %v2505_v38, %v1416_v42 }
0x12a6   :  { %1423 = vrot.lane.b32.xlu0 %v1419_v41, %s2666_s4 }
0x12a7   :  { %1425 = vrot.lane.b32.xlu1 %v1420_v43, %s2666_s4  ;;  %v1295_v7 = vpop.permute.xlu1 %1294 }
0x12a8   :  { %v1297_v9 = vmul.f32 %v2507_v29, %v1295_v7 }
0x12aa   :  { %1299 = vrot.lane.b32.xlu0 %v1297_v9, %s2666_s4 }
0x1318   :  { %v1424_v44 = vpop.permute.xlu0 %1423 }
0x1319   :  { %v1426_v45 = vpop.permute.xlu1 %1425  ;;  %v3186_v46 = vadd.f32 %v2509_v25, %v1424_v44 }
0x131a   :  { %v3188_v47 = vadd.f32 %v2511_v26, %v1426_v45 }
0x131b   :  { %v1528_v55 = vpack.c.bf16 %v3186_v46, %v3186_v46 }
0x131c   :  { %v1529_v49 = vpack.c.bf16 %v3188_v47, %v3188_v47  ;;  %v1433_v54 = vrot.slane %v3188_v47, 7  ;;  %v1300_v23 = vpop.permute.xlu0 %1299 }
0x131d   :  { %v1532_v56 = vunpack.c.l.b16 %v1528_v55  ;;  %v3198_v2 = vadd.f32 %v2513_v15, %v1300_v23 }
0x131e   :  { %v1533_v58 = vunpack.c.l.b16 %v1529_v49  ;;  %v1435_v59 = vsel %vm1434_vm9, %v1433_v54, %v3186_v46 }
0x131f   :  { %v1534_v61 = vrot.slane %v1532_v56, 5  ;;  %1436 = vrot.lane.b32.xlu0 %v1435_v59, %s2659_s6  ;;  %v1440_v50 = vrot.slane %v3198_v2, 3 }
0x1320   :  { %v1535_v19 = vrot.slane %v1533_v58, 4 }
0x1322   :  { %v1536_v62 = vsel %vm292_vm2, %v1535_v19, %v1534_v61 }
0x1323   :  { %v1537_v35 = vpack.c.b16 %v1536_v62, %v1536_v62 }
0x1325   :  { %1538 = vrot.lane.b32.xlu1 %v1537_v35, %s2659_s6 }
0x1329   :  { %1441 = vrot.lane.b32.xlu1 %v1440_v50, %s2665_s3 }
0x1391   :  { %v1437_v52 = vpop.permute.xlu0 %1436 }
0x1397   :  { %v1539_v51 = vpop.permute.xlu1 %1538 }
0x1398   :  { %2336 = vmatmul.mubr.msk.bf16.vlgmr.msra.gmra.mrb[24].mxu0 %vm174_vm3, %v1539_v51 }
0x1399   :  { %2340 = vmatpush3.bf16.msra.mxu0 %v3126_v27  ;;  %2347 = vmatprep.mubr.msk.bf16.mxu0 %vm2663_vm0, %v2662_v0 }
0x139a   :  { %2341 = vmatprep.subr.bf16.mxu0 %v2662_v0 }
0x139b   :  { %v1442_v6 = vpop.permute.xlu1 %1441 }
0x139c   :  { %v1444_v37 = vsel %vm174_vm3, %v1437_v52, %v1442_v6 }
0x139d   :  { %v1445_v38 = vpack.c.bf16 %v1444_v37, %v1444_v37  ;;  %2342 = vmatpush3.bf16.msra.mxu0 %v3136_v32 }
0x139e   :  { %2343 = vmatprep.subr.bf16.mxu0 %v2662_v0 }
0x139f   :  { %v1447_v53 = vshrl.u32 %v1445_v38, 16  ;;  %v1450_v8 = vshll.u32 %v1445_v38, 16 }
0x13a1   :  { %v1449_v48 = vrot.slane %v1447_v53, 2  ;;  %v1452_v10 = vrot.slane %v1450_v8, 3  ;;  %2344 = vmatpush3.bf16.msra.mxu0 %v3144_v63 }
0x13a2   :  { %2345 = vmatprep.subr.bf16.mxu0 %v2662_v0 }
0x13a3   :  { %v1453_v29 = vor.u32 %v1452_v10, %v1449_v48 }
0x13a5   :  { %2328 = vmatmul.mubr.msk.bf16.vlgmr.msra.gmra.mrb[24].mxu1 %vm323_vm4, %v1453_v29  ;;  %2346 = vmatpush3.bf16.msra.mxu0 %v3155_v4 }
0x13a6   :  { %2352 = vmatpush3.bf16.msra.mxu1 %v3073_v5  ;;  %2355 = vmatprep.mubr.msk.bf16.mxu1 %vm2663_vm0, %v2662_v0 }
0x13a7   :  { %2353 = vmatprep.subr.bf16.mxu1 %v2662_v0 }
0x13aa   :  { %2354 = vmatpush3.bf16.msra.mxu1 %v3158_v34 }
0x13ab   :  { %2359 = vmatprep.subr.bf16.mxu1 %v2662_v0 }
0x146b   :  { %v1577_v13 = vpop.f32.mrb[24].mxu0 }
0x146c   :  { %v2337_v14 = vpop.f32.mrb[25].mxu0  ;;  %v1602_v12 = vadd.f32 %v1577_v13, %v2810_v11  ;;  %v1584_v26 = vrot.slane %v1577_v13, 2  ;;  %v1585_v28 = vrot.slane %v1577_v13, 3 }
0x146d   :  { %v1580_v3 = vpop.f32.mrb[26].mxu0 }
0x146e   :  { %v2338_v16 = vpop.f32.mrb[27].mxu0  ;;  %v1605_v17 = vrot.slane %v1602_v12, 3  ;;  %v1604_v57 = vrot.slane %v1602_v12, 2  ;;  %v1588_v30 = vadd.f32 %v1584_v26, %v2818_v21  ;;  %v1589_v1 = vadd.f32 %v1585_v28, %v2820_v22 }
0x1470   :  { %1608 = vrot.lane.b32.xlu1 %v1605_v17, %s2659_s6  ;;  %1606 = vrot.lane.b32.xlu0 %v1604_v57, %s2659_s6  ;;  %v2122_v31 = vmul.f32 -1.442695, %v1588_v30  ;;  %v2123_v33 = vmul.f32 -1.442695, %v1589_v1 }
0x1472   :  { %2514 = vpow2.f32 %v2122_v31 }
0x1473   :  { %2516 = vpow2.f32 %v2123_v33 }
0x1478   :  { %v1491_v5 = vpop.f32.mrb[24].mxu1 }
0x1479   :  { %v1505_v18 = vadd.f32 %v1491_v5, %v2899_v24  ;;  %v2329_v20 = vpop.f32.mrb[25].mxu1  ;;  %v1497_v15 = vadd.f32 %v3228_v36, %v1491_v5  ;;  %v1504_v50 = vadd.f32 %v1491_v5, %v2915_v60 }
0x147a   :  { %v1494_v25 = vpop.f32.mrb[26].mxu1 }
0x147b   :  { %v2330_v34 = vpop.f32.mrb[27].mxu1  ;;  %1507 = vrot.lane.b32.xlu0 %v1505_v18, %s2666_s4  ;;  %v2120_v39 = vmul.f32 -1.442695, %v1497_v15 }
0x147c   :  { %v2515_v40 = vpop.eup %2514 }
0x147d   :  { %v2517_v41 = vpop.eup %2516  ;;  %2518 = vpow2.f32 %v2120_v39  ;;  %v1596_v42 = vadd.f32 1.0, %v2515_v40 }
0x147e   :  { %v1597_v43 = vadd.f32 1.0, %v2517_v41 }
0x147f   :  { %2520 = vrcp.f32 %v1596_v42 }
0x1480   :  { %2522 = vrcp.f32 %v1597_v43 }
0x1487   :  { %v2519_v7 = vpop.eup %2518 }
0x1488   :  { %v1501_v9 = vadd.f32 1.0, %v2519_v7 }
0x1489   :  { %v2521_v44 = vpop.eup %2520 }
0x148a   :  { %v2523_v45 = vpop.eup %2522  ;;  %2524 = vrcp.f32 %v1501_v9 }
0x1494   :  { %v2525_v58 = vpop.eup %2524 }
0x14e2   :  { %v1609_v55 = vpop.permute.xlu1 %1608  ;;  %v1607_v49 = vpop.permute.xlu0 %1606 }
0x14e3   :  { %v1613_v54 = vmul.f32 %v2523_v45, %v1609_v55  ;;  %v1612_v56 = vmul.f32 %v2521_v44, %v1607_v49 }
0x14e5   :  { %1618 = vrot.lane.b32.xlu0 %v1613_v54, %s2659_s6  ;;  %1616 = vrot.lane.b32.xlu1 %v1612_v56, %s2659_s6 }
0x14ed   :  { %v1508_v59 = vpop.permute.xlu0 %1507 }
0x14ee   :  { %v1510_v61 = vmul.f32 %v2525_v58, %v1508_v59 }
0x14f0   :  { %1512 = vrot.lane.b32.xlu1 %v1510_v61, %s2659_s6 }
0x1557   :  { %v1619_v19 = vpop.permute.xlu0 %1618  ;;  %v1617_v23 = vpop.permute.xlu1 %1616 }
0x1558   :  { %v1623_v62 = vadd.f32 %v1619_v19, %v2820_v22  ;;  %v1622_v35 = vadd.f32 %v1617_v23, %v2818_v21 }
0x155a   :  { %2526 = vtanh.f32 %v1623_v62 }
0x155b   :  { %2528 = vtanh.f32 %v1622_v35 }
0x1562   :  { %v1513_v51 = vpop.permute.xlu1 %1512 }
0x1563   :  { %v1515_v52 = vadd.f32 %v1513_v51, %v1504_v50 }
0x1564   :  { %v2527_v6 = vpop.eup %2526 }
0x1565   :  { %v2529_v37 = vpop.eup %2528  ;;  %2530 = vtanh.f32 %v1515_v52  ;;  %v1629_v38 = vrot.slane %v2527_v6, 1 }
0x1566   :  { %v1628_v53 = vrot.slane %v2529_v37, 1 }
0x1567   :  { %v1633_v8 = vsub.f32 %v3188_v47, %v1629_v38 }
0x1568   :  { %v1632_v48 = vsub.f32 %v3186_v46, %v1628_v53 }
0x1569   :  { %v1637_v10 = vrot.slane %v1633_v8, 7 }
0x156a   :  { %v1636_v29 = vrot.slane %v1632_v48, 7 }
0x156b   :  { %1640 = vrot.lane.b32.xlu1 %v1637_v10, %s2665_s3 }
0x156c   :  { %1638 = vrot.lane.b32.xlu0 %v1636_v29, %s2665_s3 }
0x156f   :  { %v2531_v13 = vpop.eup %2530 }
0x1570   :  { %v1517_v14 = vsub.f32 %v3198_v2, %v2531_v13 }
0x1572   :  { %1519 = vrot.lane.b32.xlu0 %v1517_v14, %s2665_s3 }
0x15dd   :  { %v1641_v12 = vpop.permute.xlu1 %1640 }
0x15de   :  { %v1639_v3 = vpop.permute.xlu0 %1638  ;;  %v1645_v16 = vmul.f32 %v2523_v45, %v1641_v12 }
0x15df   :  { %v1644_v17 = vmul.f32 %v2521_v44, %v1639_v3 }
0x15e0   :  { %1650 = vrot.lane.b32.xlu0 %v1645_v16, %s2666_s4 }
0x15e1   :  { %1648 = vrot.lane.b32.xlu1 %v1644_v17, %s2666_s4 }
0x15e4   :  { %v1520_v46 = vpop.permute.xlu0 %1519 }
0x15e5   :  { %v1522_v47 = vmul.f32 %v2525_v58, %v1520_v46 }
0x15e7   :  { %1524 = vrot.lane.b32.xlu1 %v1522_v47, %s2666_s4 }
0x1652   :  { %v1651_v57 = vpop.permute.xlu0 %1650 }
0x1653   :  { %v3246_v5 = vadd.f32 %v2527_v6, %v1651_v57  ;;  %v1649_v18 = vpop.permute.xlu1 %1648 }
0x1654   :  { %v3248_v20 = vadd.f32 %v2529_v37, %v1649_v18 }
0x1655   :  { %v1658_v2 = vrot.slane %v3246_v5, 7  ;;  %v1748_v25 = vpack.c.bf16 %v3246_v5, %v3246_v5 }
0x1656   :  { %v1747_v34 = vpack.c.bf16 %v3248_v20, %v3248_v20 }
0x1657   :  { %v1752_v26 = vunpack.c.l.b16 %v1748_v25  ;;  %v1660_v28 = vsel %vm1659_vm10, %v1658_v2, %v3248_v20 }
0x1658   :  { %v1751_v30 = vunpack.c.l.b16 %v1747_v34  ;;  %1661 = vrot.lane.b32.xlu1 %v1660_v28, %s2659_s6 }
0x1659   :  { %v1754_v1 = vrot.slane %v1752_v26, 5  ;;  %v1525_v33 = vpop.permute.xlu1 %1524 }
0x165a   :  { %v1753_v31 = vrot.slane %v1751_v30, 6  ;;  %v3258_v39 = vadd.f32 %v2531_v13, %v1525_v33 }
0x165c   :  { %v1755_v15 = vsel %vm292_vm2, %v1754_v1, %v1753_v31  ;;  %v1665_v41 = vrot.slane %v3258_v39, 2 }
0x165d   :  { %v1756_v40 = vpack.c.b16 %v1755_v15, %v1755_v15 }
0x165f   :  { %1757 = vrot.lane.b32.xlu0 %v1756_v40, %s2659_s6 }
0x1663   :  { %1666 = vrot.lane.b32.xlu0 %v1665_v41, %s2665_s3 }
0x16ca   :  { %v1662_v43 = vpop.permute.xlu1 %1661 }
0x16d1   :  { %v1758_v42 = vpop.permute.xlu0 %1757 }
0x16d2   :  { %2356 = vmatmul.mubr.msk.bf16.vlgmr.msra.gmra.mrb[28].mxu1 %vm174_vm3, %v1758_v42 }
0x16d3   :  { %2360 = vmatpush3.bf16.msra.mxu1 %v3126_v27  ;;  %2367 = vmatprep.mubr.msk.bf16.mxu1 %vm2663_vm0, %v2662_v0 }
0x16d4   :  { %2361 = vmatprep.subr.bf16.mxu1 %v2662_v0 }
0x16d5   :  { %v1667_v7 = vpop.permute.xlu0 %1666 }
0x16d6   :  { %v1669_v9 = vsel %vm174_vm3, %v1662_v43, %v1667_v7 }
0x16d7   :  { %v1670_v44 = vpack.c.bf16 %v1669_v9, %v1669_v9  ;;  %2362 = vmatpush3.bf16.msra.mxu1 %v3136_v32 }
0x16d8   :  { %2363 = vmatprep.subr.bf16.mxu1 %v2662_v0 }
0x16d9   :  { %v1672_v45 = vrot.slane %v1670_v44, 3 }
0x16db   :  { %2348 = vmatmul.mubr.msk.bf16.vlgmr.msra.gmra.mrb[28].mxu0 %vm323_vm4, %v1672_v45  ;;  %2364 = vmatpush3.bf16.msra.mxu1 %v3144_v63 }
0x16dc   :  { %2365 = vmatprep.subr.bf16.mxu1 %v2662_v0  ;;  %2379 = vmatprep.mubr.msk.f32.mxu0 %vm2663_vm0, %v2662_v0 }
0x16df   :  { %2366 = vmatpush3.bf16.msra.mxu1 %v3155_v4 }
0x17a5   :  { %v1796_v27 = vpop.f32.mrb[28].mxu1 }
0x17a6   :  { %v1821_v55 = vadd.f32 %v1796_v27, %v2810_v11  ;;  %v2357_v49 = vpop.f32.mrb[29].mxu1  ;;  %v1803_v4 = vrot.slane %v1796_v27, 1  ;;  %v1804_v23 = vrot.slane %v1796_v27, 2 }
0x17a7   :  { %v1799_v54 = vpop.f32.mrb[30].mxu1 }
0x17a8   :  { %v2358_v32 = vpop.f32.mrb[31].mxu1  ;;  %v1824_v56 = vrot.slane %v1821_v55, 2  ;;  %v1823_v58 = vrot.slane %v1821_v55, 1  ;;  %v1807_v11 = vadd.f32 %v1803_v4, %v2818_v21  ;;  %v1808_v62 = vadd.f32 %v1804_v23, %v2820_v22 }
0x17aa   :  { %1827 = vrot.lane.b32.xlu1 %v1824_v56, %s2659_s6  ;;  %1825 = vrot.lane.b32.xlu0 %v1823_v58, %s2659_s6  ;;  %v2127_v35 = vmul.f32 -1.442695, %v1807_v11  ;;  %v2128_v50 = vmul.f32 -1.442695, %v1808_v62 }
0x17ac   :  { %2532 = vpow2.f32 %v2127_v35 }
0x17ad   :  { %2534 = vpow2.f32 %v2128_v50 }
0x17ae   :  { %v1710_v63 = vpop.f32.mrb[28].mxu0 }
0x17af   :  { %v1724_v59 = vadd.f32 %v1710_v63, %v2899_v24  ;;  %v2349_v61 = vpop.f32.mrb[29].mxu0  ;;  %v1716_v51 = vadd.f32 %v3228_v36, %v1710_v63  ;;  %v1723_v25 = vadd.f32 %v1710_v63, %v2915_v60 }
0x17b0   :  { %v1713_v19 = vpop.f32.mrb[30].mxu0 }
0x17b1   :  { %1726 = vrot.lane.b32.xlu1 %v1724_v59, %s2666_s4  ;;  %v2350_v0 = vpop.f32.mrb[31].mxu0  ;;  %v2125_v52 = vmul.f32 -1.442695, %v1716_v51 }
0x17b3   :  { %2536 = vpow2.f32 %v2125_v52 }
0x17b6   :  { %v2533_v6 = vpop.eup %2532 }
0x17b7   :  { %v2535_v37 = vpop.eup %2534  ;;  %v1815_v38 = vadd.f32 1.0, %v2533_v6 }
0x17b8   :  { %v1816_v53 = vadd.f32 1.0, %v2535_v37 }
0x17b9   :  { %2538 = vrcp.f32 %v1815_v38 }
0x17ba   :  { %2540 = vrcp.f32 %v1816_v53 }
0x17bd   :  { %v2537_v8 = vpop.eup %2536 }
0x17be   :  { %v1720_v48 = vadd.f32 1.0, %v2537_v8 }
0x17c0   :  { %2542 = vrcp.f32 %v1720_v48 }
0x17c3   :  { %v2539_v10 = vpop.eup %2538 }
0x17c4   :  { %v2541_v29 = vpop.eup %2540 }
0x17ca   :  { %v2543_v16 = vpop.eup %2542 }
0x181c   :  { %v1826_v13 = vpop.permute.xlu0 %1825  ;;  %v1828_v14 = vpop.permute.xlu1 %1827 }
0x181d   :  { %v1831_v12 = vmul.f32 %v2539_v10, %v1826_v13  ;;  %v1832_v3 = vmul.f32 %v2541_v29, %v1828_v14 }
0x181f   :  { %1837 = vrot.lane.b32.xlu0 %v1832_v3, %s2659_s6  ;;  %1835 = vrot.lane.b32.xlu1 %v1831_v12, %s2659_s6 }
0x1823   :  { %v1727_v17 = vpop.permute.xlu1 %1726 }
0x1824   :  { %v1729_v46 = vmul.f32 %v2543_v16, %v1727_v17 }
0x1826   :  { %1731 = vrot.lane.b32.xlu0 %v1729_v46, %s2659_s6  ;;  %v1975_v46 = vld [vmem:[%s3350_s9 + $0x8] sm:$0xff] }
0x1891   :  { %v1838_v47 = vpop.permute.xlu0 %1837  ;;  %v1836_v57 = vpop.permute.xlu1 %1835 }
0x1892   :  { %v1842_v18 = vadd.f32 %v1838_v47, %v2820_v22  ;;  %v1841_v2 = vadd.f32 %v1836_v57, %v2818_v21  ;;  %v1976_v47 = vld [vmem:[%s3350_s9 + $0x10] sm:$0xff] }
0x1894   :  { %2544 = vtanh.f32 %v1842_v18  ;;  %v1977_v18 = vld [vmem:[%s3350_s9 + $0x18] sm:$0xff] }
0x1895   :  { %2546 = vtanh.f32 %v1841_v2  ;;  %v2386_v2 = vpack.c.bf16 %v1977_v18, %v1976_v47 }
0x1898   :  { %v1732_v34 = vpop.permute.xlu0 %1731 }
0x1899   :  { %v1734_v26 = vadd.f32 %v1732_v34, %v1723_v25 }
0x189b   :  { %2548 = vtanh.f32 %v1734_v26 }
0x189e   :  { %v2545_v28 = vpop.eup %2544 }
0x189f   :  { %v2547_v30 = vpop.eup %2546  ;;  %v1848_v1 = vrot.slane %v2545_v28, 1 }
0x18a0   :  { %v1847_v33 = vrot.slane %v2547_v30, 1 }
0x18a1   :  { %v1852_v31 = vsub.f32 %v3246_v5, %v1848_v1  ;;  %v2131_v1 = vld [vmem:[%s3351_s10] ss:$0 sm:$0xff] }
0x18a2   :  { %v1851_v21 = vsub.f32 %v3248_v20, %v1847_v33 }
0x18a3   :  { %v1856_v15 = vrot.slane %v1852_v31, 7 }
0x18a4   :  { %v1855_v41 = vrot.slane %v1851_v21, 7 }
0x18a5   :  { %v2549_v40 = vpop.eup %2548  ;;  %1859 = vrot.lane.b32.xlu0 %v1856_v15, %s2665_s3 }
0x18a6   :  { %v1736_v22 = vsub.f32 %v3258_v39, %v2549_v40 }
0x18a8   :  { %1738 = vrot.lane.b32.xlu1 %v1736_v22, %s2665_s3 }
0x18ac   :  { %1857 = vrot.lane.b32.xlu1 %v1855_v41, %s2665_s3 }
0x1917   :  { %v1860_v42 = vpop.permute.xlu0 %1859 }
0x1918   :  { %v1864_v43 = vmul.f32 %v2541_v29, %v1860_v42 }
0x191a   :  { %v1739_v7 = vpop.permute.xlu1 %1738  ;;  %1869 = vrot.lane.b32.xlu1 %v1864_v43, %s2666_s4 }
0x191b   :  { %v1741_v5 = vmul.f32 %v2543_v16, %v1739_v7 }
0x191d   :  { %1743 = vrot.lane.b32.xlu0 %v1741_v5, %s2666_s4 }
0x191e   :  { %v1858_v9 = vpop.permute.xlu1 %1857 }
0x191f   :  { %v1863_v44 = vmul.f32 %v2539_v10, %v1858_v9 }
0x1921   :  { %1867 = vrot.lane.b32.xlu0 %v1863_v44, %s2666_s4 }
0x198c   :  { %v1870_v39 = vpop.permute.xlu1 %1869 }
0x198d   :  { %v1874_v20 = vadd.f32 %v2545_v28, %v1870_v39 }
0x198f   :  { %v1744_v45 = vpop.permute.xlu0 %1743  ;;  %v1877_v54 = vrot.slane %v1874_v20, 7 }
0x1990   :  { %v1746_v27 = vadd.f32 %v2549_v40, %v1744_v45 }
0x1992   :  { %v1885_v55 = vrot.slane %v1746_v27, 1 }
0x1993   :  { %v1868_v49 = vpop.permute.xlu0 %1867 }
0x1994   :  { %v1873_v32 = vadd.f32 %v2547_v30, %v1868_v49  ;;  %1886 = vrot.lane.b32.xlu0 %v1885_v55, %s2665_s3 }
0x1996   :  { %v2400_v56 = vpack.i.bf16 %v1877_v54, %v1873_v32 }
0x1998   :  { %2401 = vrot.lane.b32.xlu1 %v2400_v56, %s2659_s6 }
0x1a06   :  { %v1887_v61 = vpop.permute.xlu0 %1886 }
0x1a0a   :  { %v2402_v58 = vpop.permute.xlu1 %2401 }
0x1a0b   :  { %v2404_v63 = vunpack.i.h.bf16 %v2402_v58  ;;  %v2403_v59 = vunpack.i.l.bf16 %v2402_v58 }
0x1a0d   :  { %v1889_v19 = vsel %vm174_vm3, %v2403_v59, %v1887_v61  ;;  %v1890_v0 = vsel %vm174_vm3, %v2404_v63, %v1887_v61 }
0x1a0e   :  { %v1891_v4 = vpack.c.bf16 %v1890_v0, %v1889_v19 }
0x1a10   :  { %v1893_v23 = vshrl.u32 %v1891_v4, 16  ;;  %v1896_v11 = vshll.u32 %v1891_v4, 16 }
0x1a12   :  { %v1895_v62 = vrot.slane %v1893_v23, 3  ;;  %v1898_v35 = vrot.slane %v1896_v11, 4 }
0x1a14   :  { %v1899_v50 = vor.u32 %v1898_v35, %v1895_v62 }
0x1a16   :  { %2368 = vmatmul.mubr.msk.bf16.vlgmr.msra.gmra.mrb[32].mxu1 %vm323_vm4, %v1899_v50 }
0x1ae9   :  { %v1937_v51 = vpop.f32.mrb[32].mxu1 }
0x1aea   :  { %v1951_v52 = vadd.f32 %v1937_v51, %v2899_v24  ;;  %v2369_v6 = vpop.f32.mrb[33].mxu1  ;;  %v1943_v53 = vadd.f32 %v3228_v36, %v1937_v51  ;;  %v1950_v12 = vadd.f32 %v1937_v51, %v2915_v60  ;;  %v1974_v36 = vld [vmem:[%s3350_s9] sm:$0xff]  ;;  %v2667_v60 = vmov 0.0|0.0   ;;  %s2668_s9 = smov [#allocation8]  }
0x1aeb   :  { %v1940_v37 = vpop.f32.mrb[34].mxu1  ;;  %2382 = vmatprep.subr.bf16.mxu0 %v2667_v60  ;;  %v2383_v57 = vpack.c.bf16 %v1975_v46, %v1974_v36  ;;  %s2068_s27 = sshll.u32 %s2668_s9, 4  ;;  %s2069_s27 = int_to_ptr.vmem [resolvable:$true] %s2068_s27 }
0x1aec   :  { %1953 = vrot.lane.b32.xlu1 %v1951_v52, %s2666_s4  ;;  %v2370_v38 = vpop.f32.mrb[35].mxu1  ;;  %v2130_v8 = vmul.f32 -1.442695, %v1943_v53  ;;  %p2634_p11 = scmp.lt.s32.totalorder %s2069_s27, %s2069_s27 }
0x1aed   :  { %2384 = vmatpush3.bf16.msra.mxu0 %v2383_v57 }
0x1aee   :  { %2550 = vpow2.f32 %v2130_v8  ;;  %2385 = vmatprep.subr.bf16.mxu0 %v2667_v60 }
0x1af1   :  { %2387 = vmatpush3.bf16.msra.mxu0 %v2386_v2 }
0x1af8   :  { %v2551_v48 = vpop.eup %2550 }
0x1af9   :  { %v1947_v10 = vadd.f32 1.0, %v2551_v48 }
0x1afb   :  { %2552 = vrcp.f32 %v1947_v10 }
0x1b05   :  { %v2553_v29 = vpop.eup %2552 }
0x1b5e   :  { %v1954_v13 = vpop.permute.xlu1 %1953 }
0x1b5f   :  { %v1956_v14 = vmul.f32 %v2553_v29, %v1954_v13 }
0x1b61   :  { %1958 = vrot.lane.b32.xlu0 %v1956_v14, %s2659_s6 }
0x1bd3   :  { %v1959_v24 = vpop.permute.xlu0 %1958 }
0x1bd4   :  { %v1961_v3 = vadd.f32 %v1959_v24, %v1950_v12 }
0x1bd6   :  { %2554 = vtanh.f32 %v1961_v3 }
0x1be0   :  { %v2555_v16 = vpop.eup %2554 }
0x1be1   :  { %v1963_v17 = vsub.f32 %v1746_v27, %v2555_v16 }
0x1be3   :  { %1965 = vrot.lane.b32.xlu1 %v1963_v17, %s2665_s3 }
0x1c55   :  { %v1966_v25 = vpop.permute.xlu1 %1965 }
0x1c56   :  { %v1968_v34 = vmul.f32 %v2553_v29, %v1966_v25 }
0x1c58   :  { %1970 = vrot.lane.b32.xlu0 %v1968_v34, %s2666_s4  ;;  %s2629_s4 = scalar_lea.vmem %s2069_s27, 32 }
0x1c59   :  { %p2630_p10 = scmp.ne.s32.totalorder %s2069_s27, %s2629_s4  ;;  %p2635_p12 = scmp.lt.s32.totalorder %s2629_s4, %s2629_s4 }
0x1c5b   :  { %p2636_p13 = por %p2635_p12, %p2634_p11 }
0x1c5d   :  { %p2637_p0 = pnand %p2636_p13, %p2630_p10 }
0x1cca   :  { %v1971_v26 = vpop.permute.xlu0 %1970 }
0x1ccb   :  { %v1973_v28 = vadd.f32 %v2555_v16, %v1971_v26 }
0x1ccd   :  { %1986 = vrot.lane.b32.xlu1 %v1973_v28, %s2659_s6 }
0x1d3f   :  { %v1987_v30 = vpop.permute.xlu1 %1986 }
0x1d40   :  { %2380 = vmatmul.mubr.msk.f32.vlgmr.msra.gmra.mrb[32].mxu0 %vm174_vm3, %v1987_v30 }
0x1e13   :  { %v2056_v31 = vpop.f32.mrb[32].mxu0 }
0x1e14   :  { %v2057_v33 = vadd.f32 %v2131_v1, %v2056_v31  ;;  %v2381_v15 = vpop.f32.mrb[33].mxu0 }
0x1e16   :  { %2061 = vst.msk [vmem:[#allocation8] sm:$0x3] %vm2060_vm11, %v2057_v33 }
0x1e17   :  { %2640 = shalt.err (!%p2637_p0)
}
0x1e18   :  { %s2641_s29 = scalar_lea.hbm %s3352_s11, 32 }
0x1e19   :  { %p2642_p1 = scmp.ne.s32.totalorder %s3352_s11, %s2641_s29  ;;  %p2645_p2 = scmp.lt.u32.totalorder %s2641_s29, %s3352_s11 }
0x1e1b   :  { %p2647_p3 = pnand %p2645_p2, %p2642_p1 }
0x1e1d   :  { %2650 = shalt.err (!%p2647_p3)
}
0x1e1e   :  { %2071 = dma.vmem_to_hbm [thread:$0]  %s2069_s27, 32, %s3352_s11, [#allocation4]  }
0x1e1f   :  { %2655 = dma.done.wait [#allocation4], 32  }
0x1e20   :  { %2656 = vsyncadd [#allocation4], 4294967264 }
0x1e21   :  { %2075 = vsyncpa [#allocation3], 1 }
0x1e22   :  { %2076 = vsyncpa [#allocation6], 1 }
0x1e23   :  { %2077 = vsyncpa [#allocation4], 1 }

</bundles_post_ra>
